<compile_context>
chip_gen: v6e
topology: v6e:2x2x1
jax: 0.10.0
libtpu: 0.0.40
codegen_flags: <defaults>
</compile_context>

<pallas_src>
import functools

import jax
import jax.numpy as jnp
from jax.experimental import pallas as pl
from jax.experimental.pallas import tpu as pltpu


def _round_up(n, m):
    return ((n + m - 1) // m) * m


def _lstm_predictor_kernel(xg_ref, w_hh_ref, w_fc_ref, b_fc_ref, out_ref,
                           *, seq_len, hidden_pad, batch_tile):
    """Serial LSTM recurrence over precomputed gate inputs, then fc + sigmoid."""
    T, Hp, Bt = seq_len, hidden_pad, batch_tile

    def step(t, carry):
        h, c = carry
        x_gates = xg_ref[t]                                    # (Bt, 4Hp) f32
        # Re-read w_hh from VMEM every step (bf16 = 32 vregs): no value whose
        # live range spans the unrolled loop, so no spill/fill on the serial
        # critical path.  bf16 operands + f32 accumulation = native MXU path.
        gates = x_gates + jnp.dot(h.astype(jnp.bfloat16), w_hh_ref[...],
                                  preferred_element_type=jnp.float32)
        sig = jax.nn.sigmoid(gates[:, :3 * Hp])                # i|f|o, one EUP pass
        i_g = sig[:, 0 * Hp:1 * Hp]
        f_g = sig[:, 1 * Hp:2 * Hp]
        o_g = sig[:, 2 * Hp:3 * Hp]
        g_g = jnp.tanh(gates[:, 3 * Hp:4 * Hp])                # one tanh pass
        c_new = f_g * c + i_g * g_g
        h_new = o_g * jnp.tanh(c_new)
        return h_new, c_new

    h0 = jnp.zeros((Bt, Hp), jnp.float32)
    c0 = jnp.zeros((Bt, Hp), jnp.float32)
    h_final, _ = jax.lax.fori_loop(0, T, step, (h0, c0),
                                   unroll=True if T <= 16 else 4)

    logits = (jnp.dot(h_final.astype(jnp.bfloat16), w_fc_ref[...],
                      preferred_element_type=jnp.float32)
              + b_fc_ref[...])                                  # (Bt, 128) lane-dense
    out_ref[...] = jax.nn.sigmoid(logits).astype(out_ref.dtype)


def _prep_params(params):
    """One-time prep: reorder gates (i,f,g,o)->(i,f,o,g), zero-pad H->Hp=128,
    transpose for x @ W, cast MXU weights to bf16, pad fc to 128 output lanes."""
    H = params["w_hh"].shape[1]
    Hp = _round_up(H, 128)

    def reorder_pad(w):                       # w: (4H, ...) stacked (i, f, g, o)
        i, f, g, o = jnp.split(w, 4, axis=0)
        pads = ((0, Hp - H),) + ((0, 0),) * (w.ndim - 1)
        return jnp.concatenate([jnp.pad(blk, pads) for blk in (i, f, o, g)], axis=0)

    w_ih = reorder_pad(params["w_ih"]).T                           # (I, 4Hp)
    w_hh = reorder_pad(params["w_hh"])                             # (4Hp, H)
    w_hh = jnp.pad(w_hh, ((0, 0), (0, Hp - H))).T                  # (Hp, 4Hp)
    b = reorder_pad((params["b_ih"] + params["b_hh"])[:, None])[:, 0]   # (4Hp,)
    w_fc = jnp.pad(params["w_fc"].T, ((0, Hp - H), (0, 128 - 2)))  # (Hp, 128)
    b_fc = jnp.pad(params["b_fc"], (0, 128 - 2))[None, :]          # (1, 128)

    return {
        "w_ih": w_ih.astype(jnp.float32),     # used by the XLA input projection
        "w_hh": w_hh.astype(jnp.bfloat16),    # MXU operand (recurrence)
        "b": b[None, :].astype(jnp.float32),  # (1, 4Hp)
        "w_fc": w_fc.astype(jnp.bfloat16),    # MXU operand (fc), lane-dense N=128
        "b_fc": b_fc.astype(jnp.float32),     # (1, 128)
    }


def _batch_tiling(B):
    Bp = _round_up(B, 8)
    if Bp <= 128:
        return Bp, Bp                         # single grid step at small B
    Bt = 128
    return _round_up(Bp, Bt), Bt


def _vmem_limit_bytes(T, Bt, Hp):
    """Per-generation-safe scoped-VMEM budget (<= 32 MiB works on v5e/v6e/v7x)."""
    xg_tile = T * Bt * 4 * Hp * 4             # f32 gate-input tile
    out_tile = Bt * 128 * 4
    weights = Hp * 4 * Hp * 2 + Hp * 128 * 2 + 128 * 4   # bf16 w_hh/w_fc + f32 b_fc
    need = 2 * (xg_tile + out_tile + weights)            # double-buffered copies
    return int(min(max(4 * need, 8 << 20), 32 << 20))


@jax.jit
def drawing_predictor_forward(x, prep):
    """x: (B, T, input_size) float32, prep: output of _prep_params.  -> (B, 2)."""
    B, T, _ = x.shape
    Hp = prep["w_hh"].shape[0]
    Bp, Bt = _batch_tiling(B)

    x_tm = jnp.swapaxes(x, 0, 1).astype(jnp.float32)             # (T, B, I)
    x_tm = jnp.pad(x_tm, ((0, 0), (0, Bp - B), (0, 0)))          # (T, Bp, I)
    # Hoisted input projection (K = input_size = 2): tiny, done by XLA and fused
    # under this jit; padded gate lanes stay exactly 0 (padded w_ih rows / b are 0).
    xg = jnp.einsum("tbi,ig->tbg", x_tm, prep["w_ih"]) + prep["b"]   # (T, Bp, 4Hp)

    kernel = functools.partial(_lstm_predictor_kernel,
                               seq_len=T, hidden_pad=Hp, batch_tile=Bt)

    out = pl.pallas_call(
        kernel,
        out_shape=jax.ShapeDtypeStruct((Bp, 128), jnp.float32),
        grid_spec=pltpu.PrefetchScalarGridSpec(
            num_scalar_prefetch=0,
            grid=(Bp // Bt,),
            in_specs=[
                pl.BlockSpec((T, Bt, 4 * Hp), lambda b: (0, b, 0)),   # xg, batch-tiled
                pl.BlockSpec((Hp, 4 * Hp), lambda b: (0, 0)),         # w_hh, resident
                pl.BlockSpec((Hp, 128), lambda b: (0, 0)),            # w_fc, resident
                pl.BlockSpec((1, 128), lambda b: (0, 0)),             # b_fc, resident
            ],
            out_specs=pl.BlockSpec((Bt, 128), lambda b: (b, 0)),
        ),
        compiler_params=pltpu.CompilerParams(
            dimension_semantics=("parallel",),
            vmem_limit_bytes=_vmem_limit_bytes(T, Bt, Hp)),
    )(xg, prep["w_hh"], prep["w_fc"], prep["b_fc"])
    return out[:B, :2]


def init_params(key, input_size=2, hidden_size=64):
    """Deterministic synthetic parameters matching nn.LSTM / nn.Linear shapes."""
    ks = jax.random.split(key, 6)
    scale = 1.0 / jnp.sqrt(hidden_size)
    u = lambda k, shape: jax.random.uniform(k, shape, jnp.float32, -scale, scale)
    return {
        "w_ih": u(ks[0], (4 * hidden_size, input_size)),   # weight_ih_l0
        "w_hh": u(ks[1], (4 * hidden_size, hidden_size)),  # weight_hh_l0
        "b_ih": u(ks[2], (4 * hidden_size,)),              # bias_ih_l0
        "b_hh": u(ks[3], (4 * hidden_size,)),              # bias_hh_l0
        "w_fc": u(ks[4], (2, hidden_size)),                # fc Linear weight
        "b_fc": u(ks[5], (2,)),                            # fc Linear bias
    }


def _reference_forward(x, params):
    """Pure-JAX f32 reference replicating PyTorch LSTM semantics."""
    H = params["w_hh"].shape[1]
    w_ih_t = params["w_ih"].T
    w_hh_t = params["w_hh"].T
    b = params["b_ih"] + params["b_hh"]

    def step(carry, x_t):
        h, c = carry
        gates = x_t @ w_ih_t + h @ w_hh_t + b
        i_g = jax.nn.sigmoid(gates[:, 0 * H:1 * H])
        f_g = jax.nn.sigmoid(gates[:, 1 * H:2 * H])
        g_g = jnp.tanh(gates[:, 2 * H:3 * H])
        o_g = jax.nn.sigmoid(gates[:, 3 * H:4 * H])
        c_new = f_g * c + i_g * g_g
        h_new = o_g * jnp.tanh(c_new)
        return (h_new, c_new), None

    B = x.shape[0]
    h0 = jnp.zeros((B, H), jnp.float32)
    c0 = jnp.zeros((B, H), jnp.float32)
    (h_final, _), _ = jax.lax.scan(step, (h0, c0), jnp.swapaxes(x, 0, 1))
    return jax.nn.sigmoid(h_final @ params["w_fc"].T + params["b_fc"])


if __name__ == "__main__":
    key = jax.random.PRNGKey(0)
    k_param, k_x = jax.random.split(key)

    batch, seq, input_size, hidden_size = 2, 8, 2, 64
    params = init_params(k_param, input_size=input_size, hidden_size=hidden_size)
    # Parameter prep done ONCE at init (not on the per-call forward path).
    prep = _prep_params(params)
    prep = jax.tree_util.tree_map(jax.block_until_ready, prep)

    x = jax.random.normal(k_x, (batch, seq, input_size), jnp.float32)

    out = jax.block_until_ready(drawing_predictor_forward(x, prep))
    ref = jax.block_until_ready(_reference_forward(x, params))

    assert out.shape == (batch, 2)
    # bf16 MXU operands in the recurrence / fc -> relaxed tolerance vs f32 reference.
    assert jnp.allclose(out, ref, atol=2e-2, rtol=2e-2), (out, ref)

    print("KERNEL_OK")
</pallas_src>

<mosaic_0001>
module attributes {stable_mosaic.version = 11 : i64} {
  func.func @_lstm_predictor_kernel(%arg0: i32, %arg1: memref<8x8x512xf32, #tpu.memory_space<vmem>>, %arg2: memref<128x512xbf16, #tpu.memory_space<vmem>>, %arg3: memref<128x128xbf16, #tpu.memory_space<vmem>>, %arg4: memref<1x128xf32, #tpu.memory_space<vmem>>, %arg5: memref<8x128xf32, #tpu.memory_space<vmem>>) attributes {dimension_semantics = [#tpu.dimension_semantics<parallel>], iteration_bounds = array<i64: 1>, scalar_prefetch = 0 : i64, scratch_operands = 0 : i64, tpu.core_type = #tpu.core_type<tc>, window_params = [{transform_indices = @transform_0, window_bounds = array<i64: 8, 8, 512>}, {pipeline_mode = #tpu.pipeline_mode<synchronous>, transform_indices = @transform_1, window_bounds = array<i64: 128, 512>}, {pipeline_mode = #tpu.pipeline_mode<synchronous>, transform_indices = @transform_2, window_bounds = array<i64: 128, 128>}, {pipeline_mode = #tpu.pipeline_mode<synchronous>, transform_indices = @transform_3, window_bounds = array<i64: 1, 128>}, {transform_indices = @transform_4, window_bounds = array<i64: 8, 128>}]} {
    %cst = arith.constant 0.000000e+00 : f32
    %0 = vector.broadcast %cst : f32 to vector<8x128xf32>
    %cst_0 = arith.constant 0.000000e+00 : f32
    %1 = vector.broadcast %cst_0 : f32 to vector<8x128xf32>
    %c0_i32 = arith.constant 0 : i32
    %2 = arith.index_cast %c0_i32 : i32 to index
    %c0 = arith.constant 0 : index
    %c0_1 = arith.constant 0 : index
    %3 = vector.load %arg1[%2, %c0, %c0_1] : memref<8x8x512xf32, #tpu.memory_space<vmem>>, vector<1x8x512xf32>
    %4 = vector.shape_cast %3 : vector<1x8x512xf32> to vector<8x512xf32>
    %5 = arith.truncf %0 : vector<8x128xf32> to vector<8x128xbf16>
    %c0_2 = arith.constant 0 : index
    %c0_3 = arith.constant 0 : index
    %6 = vector.load %arg2[%c0_2, %c0_3] : memref<128x512xbf16, #tpu.memory_space<vmem>>, vector<128x512xbf16>
    %cst_4 = arith.constant dense<0.000000e+00> : vector<8x512xf32>
    %7 = tpu.matmul %5, %6, %cst_4 {dimension_numbers = #tpu.dot_dimension_numbers<[1], [0], [0], [1], [0, 0, 1, 1], [], []>} : vector<8x128xbf16>, vector<128x512xbf16>, vector<8x512xf32> -> vector<8x512xf32>
    %8 = arith.addf %4, %7 : vector<8x512xf32>
    %9 = vector.extract_strided_slice %8 {offsets = [0, 0], sizes = [8, 384], strides = [1, 1]} : vector<8x512xf32> to vector<8x384xf32>
    %10 = arith.negf %9 : vector<8x384xf32>
    %11 = math.exp %10 : vector<8x384xf32>
    %cst_5 = arith.constant 1.000000e+00 : f32
    %12 = vector.broadcast %cst_5 : f32 to vector<8x384xf32>
    %13 = arith.addf %12, %11 : vector<8x384xf32>
    %14 = arith.divf %12, %13 : vector<8x384xf32>
    %15 = vector.extract_strided_slice %14 {offsets = [0, 0], sizes = [8, 128], strides = [1, 1]} : vector<8x384xf32> to vector<8x128xf32>
    %16 = vector.extract_strided_slice %14 {offsets = [0, 128], sizes = [8, 128], strides = [1, 1]} : vector<8x384xf32> to vector<8x128xf32>
    %17 = vector.extract_strided_slice %14 {offsets = [0, 256], sizes = [8, 128], strides = [1, 1]} : vector<8x384xf32> to vector<8x128xf32>
    %18 = vector.extract_strided_slice %8 {offsets = [0, 384], sizes = [8, 128], strides = [1, 1]} : vector<8x512xf32> to vector<8x128xf32>
    %19 = math.tanh %18 : vector<8x128xf32>
    %20 = arith.mulf %16, %1 : vector<8x128xf32>
    %21 = arith.mulf %15, %19 : vector<8x128xf32>
    %22 = arith.addf %20, %21 : vector<8x128xf32>
    %23 = math.tanh %22 : vector<8x128xf32>
    %24 = arith.mulf %17, %23 : vector<8x128xf32>
    %c1_i32 = arith.constant 1 : i32
    %25 = arith.index_cast %c1_i32 : i32 to index
    %c0_6 = arith.constant 0 : index
    %c0_7 = arith.constant 0 : index
    %26 = vector.load %arg1[%25, %c0_6, %c0_7] : memref<8x8x512xf32, #tpu.memory_space<vmem>>, vector<1x8x512xf32>
    %27 = vector.shape_cast %26 : vector<1x8x512xf32> to vector<8x512xf32>
    %28 = arith.truncf %24 : vector<8x128xf32> to vector<8x128xbf16>
    %c0_8 = arith.constant 0 : index
    %c0_9 = arith.constant 0 : index
    %29 = vector.load %arg2[%c0_8, %c0_9] : memref<128x512xbf16, #tpu.memory_space<vmem>>, vector<128x512xbf16>
    %cst_10 = arith.constant dense<0.000000e+00> : vector<8x512xf32>
    %30 = tpu.matmul %28, %29, %cst_10 {dimension_numbers = #tpu.dot_dimension_numbers<[1], [0], [0], [1], [0, 0, 1, 1], [], []>} : vector<8x128xbf16>, vector<128x512xbf16>, vector<8x512xf32> -> vector<8x512xf32>
    %31 = arith.addf %27, %30 : vector<8x512xf32>
    %32 = vector.extract_strided_slice %31 {offsets = [0, 0], sizes = [8, 384], strides = [1, 1]} : vector<8x512xf32> to vector<8x384xf32>
    %33 = arith.negf %32 : vector<8x384xf32>
    %34 = math.exp %33 : vector<8x384xf32>
    %cst_11 = arith.constant 1.000000e+00 : f32
    %35 = vector.broadcast %cst_11 : f32 to vector<8x384xf32>
    %36 = arith.addf %35, %34 : vector<8x384xf32>
    %37 = arith.divf %35, %36 : vector<8x384xf32>
    %38 = vector.extract_strided_slice %37 {offsets = [0, 0], sizes = [8, 128], strides = [1, 1]} : vector<8x384xf32> to vector<8x128xf32>
    %39 = vector.extract_strided_slice %37 {offsets = [0, 128], sizes = [8, 128], strides = [1, 1]} : vector<8x384xf32> to vector<8x128xf32>
    %40 = vector.extract_strided_slice %37 {offsets = [0, 256], sizes = [8, 128], strides = [1, 1]} : vector<8x384xf32> to vector<8x128xf32>
    %41 = vector.extract_strided_slice %31 {offsets = [0, 384], sizes = [8, 128], strides = [1, 1]} : vector<8x512xf32> to vector<8x128xf32>
    %42 = math.tanh %41 : vector<8x128xf32>
    %43 = arith.mulf %39, %22 : vector<8x128xf32>
    %44 = arith.mulf %38, %42 : vector<8x128xf32>
    %45 = arith.addf %43, %44 : vector<8x128xf32>
    %46 = math.tanh %45 : vector<8x128xf32>
    %47 = arith.mulf %40, %46 : vector<8x128xf32>
    %c2_i32 = arith.constant 2 : i32
    %48 = arith.index_cast %c2_i32 : i32 to index
    %c0_12 = arith.constant 0 : index
    %c0_13 = arith.constant 0 : index
    %49 = vector.load %arg1[%48, %c0_12, %c0_13] : memref<8x8x512xf32, #tpu.memory_space<vmem>>, vector<1x8x512xf32>
    %50 = vector.shape_cast %49 : vector<1x8x512xf32> to vector<8x512xf32>
    %51 = arith.truncf %47 : vector<8x128xf32> to vector<8x128xbf16>
    %c0_14 = arith.constant 0 : index
    %c0_15 = arith.constant 0 : index
    %52 = vector.load %arg2[%c0_14, %c0_15] : memref<128x512xbf16, #tpu.memory_space<vmem>>, vector<128x512xbf16>
    %cst_16 = arith.constant dense<0.000000e+00> : vector<8x512xf32>
    %53 = tpu.matmul %51, %52, %cst_16 {dimension_numbers = #tpu.dot_dimension_numbers<[1], [0], [0], [1], [0, 0, 1, 1], [], []>} : vector<8x128xbf16>, vector<128x512xbf16>, vector<8x512xf32> -> vector<8x512xf32>
    %54 = arith.addf %50, %53 : vector<8x512xf32>
    %55 = vector.extract_strided_slice %54 {offsets = [0, 0], sizes = [8, 384], strides = [1, 1]} : vector<8x512xf32> to vector<8x384xf32>
    %56 = arith.negf %55 : vector<8x384xf32>
    %57 = math.exp %56 : vector<8x384xf32>
    %cst_17 = arith.constant 1.000000e+00 : f32
    %58 = vector.broadcast %cst_17 : f32 to vector<8x384xf32>
    %59 = arith.addf %58, %57 : vector<8x384xf32>
    %60 = arith.divf %58, %59 : vector<8x384xf32>
    %61 = vector.extract_strided_slice %60 {offsets = [0, 0], sizes = [8, 128], strides = [1, 1]} : vector<8x384xf32> to vector<8x128xf32>
    %62 = vector.extract_strided_slice %60 {offsets = [0, 128], sizes = [8, 128], strides = [1, 1]} : vector<8x384xf32> to vector<8x128xf32>
    %63 = vector.extract_strided_slice %60 {offsets = [0, 256], sizes = [8, 128], strides = [1, 1]} : vector<8x384xf32> to vector<8x128xf32>
    %64 = vector.extract_strided_slice %54 {offsets = [0, 384], sizes = [8, 128], strides = [1, 1]} : vector<8x512xf32> to vector<8x128xf32>
    %65 = math.tanh %64 : vector<8x128xf32>
    %66 = arith.mulf %62, %45 : vector<8x128xf32>
    %67 = arith.mulf %61, %65 : vector<8x128xf32>
    %68 = arith.addf %66, %67 : vector<8x128xf32>
    %69 = math.tanh %68 : vector<8x128xf32>
    %70 = arith.mulf %63, %69 : vector<8x128xf32>
    %c3_i32 = arith.constant 3 : i32
    %71 = arith.index_cast %c3_i32 : i32 to index
    %c0_18 = arith.constant 0 : index
    %c0_19 = arith.constant 0 : index
    %72 = vector.load %arg1[%71, %c0_18, %c0_19] : memref<8x8x512xf32, #tpu.memory_space<vmem>>, vector<1x8x512xf32>
    %73 = vector.shape_cast %72 : vector<1x8x512xf32> to vector<8x512xf32>
    %74 = arith.truncf %70 : vector<8x128xf32> to vector<8x128xbf16>
    %c0_20 = arith.constant 0 : index
    %c0_21 = arith.constant 0 : index
    %75 = vector.load %arg2[%c0_20, %c0_21] : memref<128x512xbf16, #tpu.memory_space<vmem>>, vector<128x512xbf16>
    %cst_22 = arith.constant dense<0.000000e+00> : vector<8x512xf32>
    %76 = tpu.matmul %74, %75, %cst_22 {dimension_numbers = #tpu.dot_dimension_numbers<[1], [0], [0], [1], [0, 0, 1, 1], [], []>} : vector<8x128xbf16>, vector<128x512xbf16>, vector<8x512xf32> -> vector<8x512xf32>
    %77 = arith.addf %73, %76 : vector<8x512xf32>
    %78 = vector.extract_strided_slice %77 {offsets = [0, 0], sizes = [8, 384], strides = [1, 1]} : vector<8x512xf32> to vector<8x384xf32>
    %79 = arith.negf %78 : vector<8x384xf32>
    %80 = math.exp %79 : vector<8x384xf32>
    %cst_23 = arith.constant 1.000000e+00 : f32
    %81 = vector.broadcast %cst_23 : f32 to vector<8x384xf32>
    %82 = arith.addf %81, %80 : vector<8x384xf32>
    %83 = arith.divf %81, %82 : vector<8x384xf32>
    %84 = vector.extract_strided_slice %83 {offsets = [0, 0], sizes = [8, 128], strides = [1, 1]} : vector<8x384xf32> to vector<8x128xf32>
    %85 = vector.extract_strided_slice %83 {offsets = [0, 128], sizes = [8, 128], strides = [1, 1]} : vector<8x384xf32> to vector<8x128xf32>
    %86 = vector.extract_strided_slice %83 {offsets = [0, 256], sizes = [8, 128], strides = [1, 1]} : vector<8x384xf32> to vector<8x128xf32>
    %87 = vector.extract_strided_slice %77 {offsets = [0, 384], sizes = [8, 128], strides = [1, 1]} : vector<8x512xf32> to vector<8x128xf32>
    %88 = math.tanh %87 : vector<8x128xf32>
    %89 = arith.mulf %85, %68 : vector<8x128xf32>
    %90 = arith.mulf %84, %88 : vector<8x128xf32>
    %91 = arith.addf %89, %90 : vector<8x128xf32>
    %92 = math.tanh %91 : vector<8x128xf32>
    %93 = arith.mulf %86, %92 : vector<8x128xf32>
    %c4_i32 = arith.constant 4 : i32
    %94 = arith.index_cast %c4_i32 : i32 to index
    %c0_24 = arith.constant 0 : index
    %c0_25 = arith.constant 0 : index
    %95 = vector.load %arg1[%94, %c0_24, %c0_25] : memref<8x8x512xf32, #tpu.memory_space<vmem>>, vector<1x8x512xf32>
    %96 = vector.shape_cast %95 : vector<1x8x512xf32> to vector<8x512xf32>
    %97 = arith.truncf %93 : vector<8x128xf32> to vector<8x128xbf16>
    %c0_26 = arith.constant 0 : index
    %c0_27 = arith.constant 0 : index
    %98 = vector.load %arg2[%c0_26, %c0_27] : memref<128x512xbf16, #tpu.memory_space<vmem>>, vector<128x512xbf16>
    %cst_28 = arith.constant dense<0.000000e+00> : vector<8x512xf32>
    %99 = tpu.matmul %97, %98, %cst_28 {dimension_numbers = #tpu.dot_dimension_numbers<[1], [0], [0], [1], [0, 0, 1, 1], [], []>} : vector<8x128xbf16>, vector<128x512xbf16>, vector<8x512xf32> -> vector<8x512xf32>
    %100 = arith.addf %96, %99 : vector<8x512xf32>
    %101 = vector.extract_strided_slice %100 {offsets = [0, 0], sizes = [8, 384], strides = [1, 1]} : vector<8x512xf32> to vector<8x384xf32>
    %102 = arith.negf %101 : vector<8x384xf32>
    %103 = math.exp %102 : vector<8x384xf32>
    %cst_29 = arith.constant 1.000000e+00 : f32
    %104 = vector.broadcast %cst_29 : f32 to vector<8x384xf32>
    %105 = arith.addf %104, %103 : vector<8x384xf32>
    %106 = arith.divf %104, %105 : vector<8x384xf32>
    %107 = vector.extract_strided_slice %106 {offsets = [0, 0], sizes = [8, 128], strides = [1, 1]} : vector<8x384xf32> to vector<8x128xf32>
    %108 = vector.extract_strided_slice %106 {offsets = [0, 128], sizes = [8, 128], strides = [1, 1]} : vector<8x384xf32> to vector<8x128xf32>
    %109 = vector.extract_strided_slice %106 {offsets = [0, 256], sizes = [8, 128], strides = [1, 1]} : vector<8x384xf32> to vector<8x128xf32>
    %110 = vector.extract_strided_slice %100 {offsets = [0, 384], sizes = [8, 128], strides = [1, 1]} : vector<8x512xf32> to vector<8x128xf32>
    %111 = math.tanh %110 : vector<8x128xf32>
    %112 = arith.mulf %108, %91 : vector<8x128xf32>
    %113 = arith.mulf %107, %111 : vector<8x128xf32>
    %114 = arith.addf %112, %113 : vector<8x128xf32>
    %115 = math.tanh %114 : vector<8x128xf32>
    %116 = arith.mulf %109, %115 : vector<8x128xf32>
    %c5_i32 = arith.constant 5 : i32
    %117 = arith.index_cast %c5_i32 : i32 to index
    %c0_30 = arith.constant 0 : index
    %c0_31 = arith.constant 0 : index
    %118 = vector.load %arg1[%117, %c0_30, %c0_31] : memref<8x8x512xf32, #tpu.memory_space<vmem>>, vector<1x8x512xf32>
    %119 = vector.shape_cast %118 : vector<1x8x512xf32> to vector<8x512xf32>
    %120 = arith.truncf %116 : vector<8x128xf32> to vector<8x128xbf16>
    %c0_32 = arith.constant 0 : index
    %c0_33 = arith.constant 0 : index
    %121 = vector.load %arg2[%c0_32, %c0_33] : memref<128x512xbf16, #tpu.memory_space<vmem>>, vector<128x512xbf16>
    %cst_34 = arith.constant dense<0.000000e+00> : vector<8x512xf32>
    %122 = tpu.matmul %120, %121, %cst_34 {dimension_numbers = #tpu.dot_dimension_numbers<[1], [0], [0], [1], [0, 0, 1, 1], [], []>} : vector<8x128xbf16>, vector<128x512xbf16>, vector<8x512xf32> -> vector<8x512xf32>
    %123 = arith.addf %119, %122 : vector<8x512xf32>
    %124 = vector.extract_strided_slice %123 {offsets = [0, 0], sizes = [8, 384], strides = [1, 1]} : vector<8x512xf32> to vector<8x384xf32>
    %125 = arith.negf %124 : vector<8x384xf32>
    %126 = math.exp %125 : vector<8x384xf32>
    %cst_35 = arith.constant 1.000000e+00 : f32
    %127 = vector.broadcast %cst_35 : f32 to vector<8x384xf32>
    %128 = arith.addf %127, %126 : vector<8x384xf32>
    %129 = arith.divf %127, %128 : vector<8x384xf32>
    %130 = vector.extract_strided_slice %129 {offsets = [0, 0], sizes = [8, 128], strides = [1, 1]} : vector<8x384xf32> to vector<8x128xf32>
    %131 = vector.extract_strided_slice %129 {offsets = [0, 128], sizes = [8, 128], strides = [1, 1]} : vector<8x384xf32> to vector<8x128xf32>
    %132 = vector.extract_strided_slice %129 {offsets = [0, 256], sizes = [8, 128], strides = [1, 1]} : vector<8x384xf32> to vector<8x128xf32>
    %133 = vector.extract_strided_slice %123 {offsets = [0, 384], sizes = [8, 128], strides = [1, 1]} : vector<8x512xf32> to vector<8x128xf32>
    %134 = math.tanh %133 : vector<8x128xf32>
    %135 = arith.mulf %131, %114 : vector<8x128xf32>
    %136 = arith.mulf %130, %134 : vector<8x128xf32>
    %137 = arith.addf %135, %136 : vector<8x128xf32>
    %138 = math.tanh %137 : vector<8x128xf32>
    %139 = arith.mulf %132, %138 : vector<8x128xf32>
    %c6_i32 = arith.constant 6 : i32
    %140 = arith.index_cast %c6_i32 : i32 to index
    %c0_36 = arith.constant 0 : index
    %c0_37 = arith.constant 0 : index
    %141 = vector.load %arg1[%140, %c0_36, %c0_37] : memref<8x8x512xf32, #tpu.memory_space<vmem>>, vector<1x8x512xf32>
    %142 = vector.shape_cast %141 : vector<1x8x512xf32> to vector<8x512xf32>
    %143 = arith.truncf %139 : vector<8x128xf32> to vector<8x128xbf16>
    %c0_38 = arith.constant 0 : index
    %c0_39 = arith.constant 0 : index
    %144 = vector.load %arg2[%c0_38, %c0_39] : memref<128x512xbf16, #tpu.memory_space<vmem>>, vector<128x512xbf16>
    %cst_40 = arith.constant dense<0.000000e+00> : vector<8x512xf32>
    %145 = tpu.matmul %143, %144, %cst_40 {dimension_numbers = #tpu.dot_dimension_numbers<[1], [0], [0], [1], [0, 0, 1, 1], [], []>} : vector<8x128xbf16>, vector<128x512xbf16>, vector<8x512xf32> -> vector<8x512xf32>
    %146 = arith.addf %142, %145 : vector<8x512xf32>
    %147 = vector.extract_strided_slice %146 {offsets = [0, 0], sizes = [8, 384], strides = [1, 1]} : vector<8x512xf32> to vector<8x384xf32>
    %148 = arith.negf %147 : vector<8x384xf32>
    %149 = math.exp %148 : vector<8x384xf32>
    %cst_41 = arith.constant 1.000000e+00 : f32
    %150 = vector.broadcast %cst_41 : f32 to vector<8x384xf32>
    %151 = arith.addf %150, %149 : vector<8x384xf32>
    %152 = arith.divf %150, %151 : vector<8x384xf32>
    %153 = vector.extract_strided_slice %152 {offsets = [0, 0], sizes = [8, 128], strides = [1, 1]} : vector<8x384xf32> to vector<8x128xf32>
    %154 = vector.extract_strided_slice %152 {offsets = [0, 128], sizes = [8, 128], strides = [1, 1]} : vector<8x384xf32> to vector<8x128xf32>
    %155 = vector.extract_strided_slice %152 {offsets = [0, 256], sizes = [8, 128], strides = [1, 1]} : vector<8x384xf32> to vector<8x128xf32>
    %156 = vector.extract_strided_slice %146 {offsets = [0, 384], sizes = [8, 128], strides = [1, 1]} : vector<8x512xf32> to vector<8x128xf32>
    %157 = math.tanh %156 : vector<8x128xf32>
    %158 = arith.mulf %154, %137 : vector<8x128xf32>
    %159 = arith.mulf %153, %157 : vector<8x128xf32>
    %160 = arith.addf %158, %159 : vector<8x128xf32>
    %161 = math.tanh %160 : vector<8x128xf32>
    %162 = arith.mulf %155, %161 : vector<8x128xf32>
    %c7_i32 = arith.constant 7 : i32
    %163 = arith.index_cast %c7_i32 : i32 to index
    %c0_42 = arith.constant 0 : index
    %c0_43 = arith.constant 0 : index
    %164 = vector.load %arg1[%163, %c0_42, %c0_43] : memref<8x8x512xf32, #tpu.memory_space<vmem>>, vector<1x8x512xf32>
    %165 = vector.shape_cast %164 : vector<1x8x512xf32> to vector<8x512xf32>
    %166 = arith.truncf %162 : vector<8x128xf32> to vector<8x128xbf16>
    %c0_44 = arith.constant 0 : index
    %c0_45 = arith.constant 0 : index
    %167 = vector.load %arg2[%c0_44, %c0_45] : memref<128x512xbf16, #tpu.memory_space<vmem>>, vector<128x512xbf16>
    %cst_46 = arith.constant dense<0.000000e+00> : vector<8x512xf32>
    %168 = tpu.matmul %166, %167, %cst_46 {dimension_numbers = #tpu.dot_dimension_numbers<[1], [0], [0], [1], [0, 0, 1, 1], [], []>} : vector<8x128xbf16>, vector<128x512xbf16>, vector<8x512xf32> -> vector<8x512xf32>
    %169 = arith.addf %165, %168 : vector<8x512xf32>
    %170 = vector.extract_strided_slice %169 {offsets = [0, 0], sizes = [8, 384], strides = [1, 1]} : vector<8x512xf32> to vector<8x384xf32>
    %171 = arith.negf %170 : vector<8x384xf32>
    %172 = math.exp %171 : vector<8x384xf32>
    %cst_47 = arith.constant 1.000000e+00 : f32
    %173 = vector.broadcast %cst_47 : f32 to vector<8x384xf32>
    %174 = arith.addf %173, %172 : vector<8x384xf32>
    %175 = arith.divf %173, %174 : vector<8x384xf32>
    %176 = vector.extract_strided_slice %175 {offsets = [0, 0], sizes = [8, 128], strides = [1, 1]} : vector<8x384xf32> to vector<8x128xf32>
    %177 = vector.extract_strided_slice %175 {offsets = [0, 128], sizes = [8, 128], strides = [1, 1]} : vector<8x384xf32> to vector<8x128xf32>
    %178 = vector.extract_strided_slice %175 {offsets = [0, 256], sizes = [8, 128], strides = [1, 1]} : vector<8x384xf32> to vector<8x128xf32>
    %179 = vector.extract_strided_slice %169 {offsets = [0, 384], sizes = [8, 128], strides = [1, 1]} : vector<8x512xf32> to vector<8x128xf32>
    %180 = math.tanh %179 : vector<8x128xf32>
    %181 = arith.mulf %177, %160 : vector<8x128xf32>
    %182 = arith.mulf %176, %180 : vector<8x128xf32>
    %183 = arith.addf %181, %182 : vector<8x128xf32>
    %184 = math.tanh %183 : vector<8x128xf32>
    %185 = arith.mulf %178, %184 : vector<8x128xf32>
    %c8_i32 = arith.constant 8 : i32
    %186 = arith.truncf %185 : vector<8x128xf32> to vector<8x128xbf16>
    %c0_48 = arith.constant 0 : index
    %c0_49 = arith.constant 0 : index
    %187 = vector.load %arg3[%c0_48, %c0_49] : memref<128x128xbf16, #tpu.memory_space<vmem>>, vector<128x128xbf16>
    %cst_50 = arith.constant dense<0.000000e+00> : vector<8x128xf32>
    %188 = tpu.matmul %186, %187, %cst_50 {dimension_numbers = #tpu.dot_dimension_numbers<[1], [0], [0], [1], [0, 0, 1, 1], [], []>} : vector<8x128xbf16>, vector<128x128xbf16>, vector<8x128xf32> -> vector<8x128xf32>
    %c0_51 = arith.constant 0 : index
    %c0_52 = arith.constant 0 : index
    %189 = vector.load %arg4[%c0_51, %c0_52] : memref<1x128xf32, #tpu.memory_space<vmem>>, vector<1x128xf32>
    %190 = vector.broadcast %189 : vector<1x128xf32> to vector<8x128xf32>
    %191 = arith.addf %188, %190 : vector<8x128xf32>
    %192 = arith.negf %191 : vector<8x128xf32>
    %193 = math.exp %192 : vector<8x128xf32>
    %cst_53 = arith.constant 1.000000e+00 : f32
    %194 = vector.broadcast %cst_53 : f32 to vector<8x128xf32>
    %195 = arith.addf %194, %193 : vector<8x128xf32>
    %196 = arith.divf %194, %195 : vector<8x128xf32>
    %c0_54 = arith.constant 0 : index
    %c0_55 = arith.constant 0 : index
    %197 = vector.load %arg5[%c0_54, %c0_55] : memref<8x128xf32, #tpu.memory_space<vmem>>, vector<8x128xf32>
    tpu.vector_store %arg5[%c0_54, %c0_55], %196 {strides = array<i32>} : memref<8x128xf32, #tpu.memory_space<vmem>>, vector<8x128xf32>,
    return
  }
  func.func @transform_0(%arg0: i32) -> (i32, i32, i32) {
    %c0_i32 = arith.constant 0 : i32
    %c0_i32_0 = arith.constant 0 : i32
    %c0_i32_1 = arith.constant 0 : i32
    return %c0_i32, %arg0, %c0_i32_0 : i32, i32, i32
  }
  func.func @transform_1(%arg0: i32) -> (i32, i32) {
    %c0_i32 = arith.constant 0 : i32
    %c0_i32_0 = arith.constant 0 : i32
    %c0_i32_1 = arith.constant 0 : i32
    return %c0_i32, %c0_i32_0 : i32, i32
  }
  func.func @transform_2(%arg0: i32) -> (i32, i32) {
    %c0_i32 = arith.constant 0 : i32
    %c0_i32_0 = arith.constant 0 : i32
    %c0_i32_1 = arith.constant 0 : i32
    return %c0_i32, %c0_i32_0 : i32, i32
  }
  func.func @transform_3(%arg0: i32) -> (i32, i32) {
    %c0_i32 = arith.constant 0 : i32
    %c0_i32_0 = arith.constant 0 : i32
    %c0_i32_1 = arith.constant 0 : i32
    return %c0_i32, %c0_i32_0 : i32, i32
  }
  func.func @transform_4(%arg0: i32) -> (i32, i32) {
    %c0_i32 = arith.constant 0 : i32
    %c0_i32_0 = arith.constant 0 : i32
    return %arg0, %c0_i32 : i32, i32
  }
}

</mosaic_0001>

<bundles_post_ra>
// kernel: drawing_predictor_forward.1
= control target key start
LH: loop header
LB: loop body
LE: loop exit
PB: predicated region body
PF: predicated region fallthrough
CT: control target
= control target key end

     0   :  { %9 = vsyncpa [#allocation3], 0  ;;  %s1645_s15 = smov [#allocation2]   ;;  %s2307_s0 = inlined_call_operand.vmem [shape: f32[8,8,512], index: 0, kind: input, shape index: {}]   ;;  %s2308_s1 = inlined_call_operand.vmem [shape: bf16[128,512], index: 1, kind: input, shape index: {}]   ;;  %s2309_s2 = inlined_call_operand.hbm [shape: bf16[128,128], index: 2, kind: input, shape index: {}]   ;;  %s2310_s3 = inlined_call_operand.vmem [shape: f32[1,128], index: 3, kind: input, shape index: {}]   ;;  %s2311_s4 = inlined_call_operand.vmem [shape: f32[8,128], index: 4, kind: output, shape index: {}]  }
   0x1   :  { %s19_s16 = sshll.u32 %s1645_s15, 4  ;;  %s20_s16 = int_to_ptr.vmem [resolvable:$true] %s19_s16 }
   0x2   :  { %s1631_s17 = scalar_lea.vmem %s20_s16, 1024  ;;  %p1636_p1 = scmp.lt.s32.totalorder %s20_s16, %s20_s16 }
   0x3   :  { %p1632_p0 = scmp.ne.s32.totalorder %s20_s16, %s1631_s17  ;;  %p1637_p2 = scmp.lt.s32.totalorder %s1631_s17, %s1631_s17 }
   0x5   :  { %p1638_p3 = por %p1637_p2, %p1636_p1 }
   0x7   :  { %p1639_p4 = pnand %p1638_p3, %p1632_p0 }
   0x9   :  { %1642 = shalt.err (!%p1639_p4)
}
   0xa   :  { %s1646_s18 = smov 64   ;;  %s1647_s19 = smov 4  }
   0xb   :  { %25 = dma.hbm_to_vmem [thread:$0]  %s2309_s2, 1024, %s20_s16, [#allocation3], %s1646_s18, %s1646_s18, %s1647_s19  }
   0xc   :  { %1643 = dma.done.wait [#allocation3], 1024  }
   0xd   :  { %1644 = vsyncadd [#allocation3], 4294966272  ;;  %v1648_v0 = vmov 0   ;;  %v1684_v1 = vld [vmem:[%s2308_s1 + $0xe4] ss:$16 sps:$4 sm:$0xff]   ;;  %v33_v35 = vld [vmem:[%s2307_s0 + $0x8] sm:$0xff] }
   0xe   :  { %260 = vmatprep.mubr.bf16.mxu0 %v1648_v0  ;;  %301 = vmatprep.mubr.bf16.mxu1 %v1648_v0  ;;  %v1689_v2 = vld [vmem:[%s2308_s1 + $0xe0] ss:$16 sps:$4 sm:$0xff]   ;;  %v1695_v3 = vld [vmem:[%s2308_s1 + $0xc4] ss:$16 sps:$4 sm:$0xff]   ;;  %v1712_v6 = vld [vmem:[%s2308_s1 + $0xec] ss:$16 sps:$4 sm:$0xff]  }
   0xf   :  { %228 = vmatprep.subr.bf16.mxu0 %v1684_v1  ;;  %v1701_v4 = vld [vmem:[%s2308_s1 + $0xc0] ss:$16 sps:$4 sm:$0xff]   ;;  %v1707_v5 = vld [vmem:[%s2308_s1 + $0xa4] ss:$16 sps:$4 sm:$0xff]   ;;  %v1717_v7 = vld [vmem:[%s2308_s1 + $0xe8] ss:$16 sps:$4 sm:$0xff]   ;;  %269 = vmatprep.subr.bf16.mxu1 %v1712_v6 }
  0x10   :  { %229 = vmatpush1.bf16.msra.mxu0 %v1689_v2  ;;  %v1723_v8 = vld [vmem:[%s2308_s1 + $0xa0] ss:$16 sps:$4 sm:$0xff]   ;;  %v1730_v9 = vld [vmem:[%s2308_s1 + $0x84] ss:$16 sps:$4 sm:$0xff]   ;;  %270 = vmatpush1.bf16.msra.mxu1 %v1717_v7  ;;  %v1736_v10 = vld [vmem:[%s2308_s1 + $0xcc] ss:$16 sps:$4 sm:$0xff]  }
  0x11   :  { %230 = vmatprep.subr.bf16.mxu0 %v1695_v3  ;;  %v1741_v11 = vld [vmem:[%s2308_s1 + $0xc8] ss:$16 sps:$4 sm:$0xff]   ;;  %271 = vmatprep.subr.bf16.mxu1 %v1736_v10  ;;  %v1748_v12 = vld [vmem:[%s2308_s1 + $0x80] ss:$16 sps:$4 sm:$0xff]   ;;  %v1753_v13 = vld [vmem:[%s2308_s1 + $0x64] ss:$16 sps:$4 sm:$0xff]  }
  0x12   :  { %v1758_v14 = vld [vmem:[%s2308_s1 + $0xac] ss:$16 sps:$4 sm:$0xff]   ;;  %v1765_v15 = vld [vmem:[%s2308_s1 + $0xa8] ss:$16 sps:$4 sm:$0xff]   ;;  %v1777_v17 = vld [vmem:[%s2308_s1 + $0x60] ss:$16 sps:$4 sm:$0xff]  }
  0x13   :  { %v1771_v16 = vld [vmem:[%s2308_s1 + $0x8c] ss:$16 sps:$4 sm:$0xff]   ;;  %v1783_v18 = vld [vmem:[%s2308_s1 + $0x44] ss:$16 sps:$4 sm:$0xff]   ;;  %v1789_v19 = vld [vmem:[%s2308_s1 + $0x88] ss:$16 sps:$4 sm:$0xff]  }
  0x14   :  { %231 = vmatpush1.bf16.msra.mxu0 %v1701_v4  ;;  %272 = vmatpush1.bf16.msra.mxu1 %v1741_v11  ;;  %v1795_v20 = vld [vmem:[%s2308_s1 + $0x6c] ss:$16 sps:$4 sm:$0xff]   ;;  %v1801_v21 = vld [vmem:[%s2308_s1 + $0x40] ss:$16 sps:$4 sm:$0xff]   ;;  %v1806_v22 = vld [vmem:[%s2308_s1 + $0x24] ss:$16 sps:$4 sm:$0xff]  }
  0x15   :  { %232 = vmatprep.subr.bf16.mxu0 %v1707_v5  ;;  %273 = vmatprep.subr.bf16.mxu1 %v1758_v14  ;;  %v1813_v23 = vld [vmem:[%s2308_s1 + $0x68] ss:$16 sps:$4 sm:$0xff]   ;;  %v1818_v24 = vld [vmem:[%s2308_s1 + $0x20] ss:$16 sps:$4 sm:$0xff]   ;;  %v1824_v25 = vld [vmem:[%s2308_s1 + $0x4c] ss:$16 sps:$4 sm:$0xff]  }
  0x16   :  { %v1829_v26 = vld [vmem:[%s2308_s1 + $0x4] ss:$16 sps:$4 sm:$0xff]   ;;  %v1834_v27 = vld [vmem:[%s2308_s1 + $0x48] ss:$16 sps:$4 sm:$0xff]   ;;  %v1840_v28 = vld [vmem:[%s2308_s1 + $0x2c] ss:$16 sps:$4 sm:$0xff]  }
  0x17   :  { %v1849_v29 = vld [vmem:[%s2308_s1] ss:$16 sps:$4 sm:$0xff]   ;;  %v1856_v30 = vld [vmem:[%s2308_s1 + $0x28] ss:$16 sps:$4 sm:$0xff]   ;;  %v1862_v31 = vld [vmem:[%s2308_s1 + $0xc] ss:$16 sps:$4 sm:$0xff]  }
  0x18   :  { %233 = vmatpush1.bf16.msra.mxu0 %v1723_v8  ;;  %274 = vmatpush1.bf16.msra.mxu1 %v1765_v15  ;;  %v1869_v32 = vld [vmem:[%s2308_s1 + $0x8] ss:$16 sps:$4 sm:$0xff]   ;;  %v32_v33 = vld [vmem:[%s2307_s0] sm:$0xff]  ;;  %v34_v45 = vld [vmem:[%s2307_s0 + $0x10] sm:$0xff]  ;;  %vm1650_vm0 = vmmov 0  }
  0x19   :  { %234 = vmatprep.subr.bf16.mxu0 %v1730_v9  ;;  %275 = vmatprep.subr.bf16.mxu1 %v1771_v16  ;;  %v35_v49 = vld [vmem:[%s2307_s0 + $0x18] sm:$0xff] }
  0x1c   :  { %235 = vmatpush1.bf16.msra.mxu0 %v1748_v12  ;;  %276 = vmatpush1.bf16.msra.mxu1 %v1789_v19 }
  0x1d   :  { %236 = vmatprep.subr.bf16.mxu0 %v1753_v13  ;;  %277 = vmatprep.subr.bf16.mxu1 %v1795_v20 }
  0x20   :  { %237 = vmatpush1.bf16.msra.mxu0 %v1777_v17  ;;  %278 = vmatpush1.bf16.msra.mxu1 %v1813_v23 }
  0x21   :  { %238 = vmatprep.subr.bf16.mxu0 %v1783_v18  ;;  %279 = vmatprep.subr.bf16.mxu1 %v1824_v25 }
  0x24   :  { %239 = vmatpush1.bf16.msra.mxu0 %v1801_v21  ;;  %280 = vmatpush1.bf16.msra.mxu1 %v1834_v27 }
  0x25   :  { %240 = vmatprep.subr.bf16.mxu0 %v1806_v22  ;;  %281 = vmatprep.subr.bf16.mxu1 %v1840_v28 }
  0x28   :  { %241 = vmatpush1.bf16.msra.mxu0 %v1818_v24  ;;  %282 = vmatpush1.bf16.msra.mxu1 %v1856_v30 }
  0x29   :  { %242 = vmatprep.subr.bf16.mxu0 %v1829_v26  ;;  %283 = vmatprep.subr.bf16.mxu1 %v1862_v31 }
  0x2c   :  { %243 = vmatpush1.bf16.msra.mxu0 %v1849_v29  ;;  %284 = vmatpush1.bf16.msra.mxu1 %v1869_v32 }
  0x2d   :  { %344 = vmatprep.subr.bf16.mxu0 %v1684_v1  ;;  %385 = vmatprep.subr.bf16.mxu1 %v1712_v6 }
  0x2f   :  { %261 = vmatmul.mubr.bf16.vlgmr.msra.gmra.mxu0 %v1648_v0  ;;  %302 = vmatmul.mubr.bf16.vlgmr.msra.gmra.mxu1 %v1648_v0 }
  0x30   :  { %345 = vmatpush1.bf16.msra.mxu0 %v1689_v2  ;;  %376 = vmatprep.mubr.bf16.mxu0 %v1648_v0 }
  0x31   :  { %346 = vmatprep.subr.bf16.mxu0 %v1695_v3  ;;  %386 = vmatpush1.bf16.msra.mxu1 %v1717_v7 }
  0x32   :  { %387 = vmatprep.subr.bf16.mxu1 %v1736_v10  ;;  %417 = vmatprep.mubr.bf16.mxu1 %v1648_v0 }
  0x34   :  { %347 = vmatpush1.bf16.msra.mxu0 %v1701_v4 }
  0x35   :  { %348 = vmatprep.subr.bf16.mxu0 %v1707_v5  ;;  %388 = vmatpush1.bf16.msra.mxu1 %v1741_v11 }
  0x36   :  { %389 = vmatprep.subr.bf16.mxu1 %v1758_v14 }
  0x38   :  { %349 = vmatpush1.bf16.msra.mxu0 %v1723_v8 }
  0x39   :  { %350 = vmatprep.subr.bf16.mxu0 %v1730_v9  ;;  %390 = vmatpush1.bf16.msra.mxu1 %v1765_v15 }
  0x3a   :  { %391 = vmatprep.subr.bf16.mxu1 %v1771_v16 }
  0x3c   :  { %351 = vmatpush1.bf16.msra.mxu0 %v1748_v12 }
  0x3d   :  { %352 = vmatprep.subr.bf16.mxu0 %v1753_v13  ;;  %392 = vmatpush1.bf16.msra.mxu1 %v1789_v19 }
  0x3e   :  { %393 = vmatprep.subr.bf16.mxu1 %v1795_v20 }
  0x40   :  { %353 = vmatpush1.bf16.msra.mxu0 %v1777_v17 }
  0x41   :  { %354 = vmatprep.subr.bf16.mxu0 %v1783_v18  ;;  %394 = vmatpush1.bf16.msra.mxu1 %v1813_v23 }
  0x42   :  { %395 = vmatprep.subr.bf16.mxu1 %v1824_v25 }
  0x44   :  { %355 = vmatpush1.bf16.msra.mxu0 %v1801_v21 }
  0x45   :  { %356 = vmatprep.subr.bf16.mxu0 %v1806_v22  ;;  %396 = vmatpush1.bf16.msra.mxu1 %v1834_v27 }
  0x46   :  { %397 = vmatprep.subr.bf16.mxu1 %v1840_v28 }
  0x48   :  { %357 = vmatpush1.bf16.msra.mxu0 %v1818_v24 }
  0x49   :  { %358 = vmatprep.subr.bf16.mxu0 %v1829_v26  ;;  %398 = vmatpush1.bf16.msra.mxu1 %v1856_v30 }
  0x4a   :  { %399 = vmatprep.subr.bf16.mxu1 %v1862_v31 }
  0x4c   :  { %359 = vmatpush1.bf16.msra.mxu0 %v1849_v29 }
  0x4d   :  { %460 = vmatprep.subr.bf16.mxu0 %v1684_v1  ;;  %400 = vmatpush1.bf16.msra.mxu1 %v1869_v32 }
  0x4e   :  { %501 = vmatprep.subr.bf16.mxu1 %v1712_v6 }
  0xef   :  { %v262_v34 = vpop.f32.mrf.mxu0  ;;  %v303_v42 = vpop.f32.mrf.mxu1 }
  0xf0   :  { %v310_v36 = vadd.f32 %v262_v34, %v32_v33  ;;  %v312_v47 = vadd.f32 %v303_v42, %v34_v45 }
  0xf1   :  { %v264_v37 = vpop.f32.mrf.mxu0  ;;  %v305_v44 = vpop.f32.mrf.mxu1 }
  0xf2   :  { %v1306_v38 = vmul.f32 -1.442695, %v310_v36  ;;  %v311_v39 = vadd.f32 %v264_v37, %v33_v35  ;;  %v1308_v50 = vmul.f32 -1.442695, %v312_v47  ;;  %v313_v51 = vadd.f32 %v305_v44, %v35_v49  ;;  %v1309_v37 = vld [vmem:[%s2307_s0 + $0x20] sm:$0xff] }
  0xf3   :  { %v266_v40 = vpop.f32.mrf.mxu0  ;;  %v307_v46 = vpop.f32.mrf.mxu1 }
  0xf4   :  { %1459 = vpow2.f32 %v1306_v38  ;;  %v1307_v41 = vmul.f32 -1.442695, %v311_v39  ;;  %v1310_v40 = vld [vmem:[%s2307_s0 + $0x28] sm:$0xff] }
  0xf5   :  { %v267_v43 = vpop.f32.mrf.mxu0  ;;  %v308_v48 = vpop.f32.mrf.mxu1 }
  0xf6   :  { %1461 = vpow2.f32 %v1307_v41 }
  0xf7   :  { %1463 = vpow2.f32 %v1308_v50 }
  0xf8   :  { %1465 = vtanh.f32 %v313_v51  ;;  %v1311_v51 = vld [vmem:[%s2307_s0 + $0x30] sm:$0xff] }
 0x101   :  { %v1460_v52 = vpop.eup %1459 }
 0x102   :  { %v323_v53 = vadd.f32 1.0, %v1460_v52 }
 0x103   :  { %v1462_v54 = vpop.eup %1461 }
 0x104   :  { %1467 = vrcp.f32 %v323_v53  ;;  %v324_v55 = vadd.f32 1.0, %v1462_v54  ;;  %v1464_v56 = vpop.eup %1463  ;;  %v1312_v53 = vld [vmem:[%s2307_s0 + $0x38] sm:$0xff] }
 0x105   :  { %v1466_v57 = vpop.eup %1465  ;;  %v325_v60 = vadd.f32 1.0, %v1464_v56 }
 0x106   :  { %1469 = vrcp.f32 %v324_v55 }
 0x107   :  { %1471 = vrcp.f32 %v325_v60 }
 0x111   :  { %v1468_v58 = vpop.eup %1467 }
 0x112   :  { %v334_v62 = vmul.f32 %v1468_v58, %v1466_v57 }
 0x113   :  { %v1470_v59 = vpop.eup %1469 }
 0x114   :  { %v333_v61 = vmul.f32 0.0, %v1470_v59  ;;  %v1472_v33 = vpop.eup %1471 }
 0x116   :  { %v1923_v63 = vadd.f32 %v334_v62, %v333_v61 }
 0x118   :  { %1473 = vtanh.f32 %v1923_v63 }
 0x125   :  { %v1474_v34 = vpop.eup %1473 }
 0x126   :  { %v337_v35 = vmul.f32 %v1474_v34, %v1472_v33 }
 0x128   :  { %v343_v36 = vpack.c.bf16 %v337_v35, %v337_v35 }
 0x12a   :  { %377 = vmatmul.mubr.bf16.vlgmr.msra.gmra.mxu0 %v343_v36  ;;  %418 = vmatmul.mubr.bf16.vlgmr.msra.gmra.mxu1 %v343_v36 }
 0x12b   :  { %461 = vmatpush1.bf16.msra.mxu0 %v1689_v2  ;;  %502 = vmatpush1.bf16.msra.mxu1 %v1717_v7 }
 0x12c   :  { %462 = vmatprep.subr.bf16.mxu0 %v1695_v3  ;;  %503 = vmatprep.subr.bf16.mxu1 %v1736_v10 }
 0x12d   :  { %492 = vmatprep.mubr.bf16.mxu0 %v1648_v0  ;;  %533 = vmatprep.mubr.bf16.mxu1 %v1648_v0 }
 0x12f   :  { %463 = vmatpush1.bf16.msra.mxu0 %v1701_v4  ;;  %504 = vmatpush1.bf16.msra.mxu1 %v1741_v11 }
 0x130   :  { %464 = vmatprep.subr.bf16.mxu0 %v1707_v5  ;;  %505 = vmatprep.subr.bf16.mxu1 %v1758_v14 }
 0x133   :  { %465 = vmatpush1.bf16.msra.mxu0 %v1723_v8  ;;  %506 = vmatpush1.bf16.msra.mxu1 %v1765_v15 }
 0x134   :  { %466 = vmatprep.subr.bf16.mxu0 %v1730_v9  ;;  %507 = vmatprep.subr.bf16.mxu1 %v1771_v16 }
 0x137   :  { %467 = vmatpush1.bf16.msra.mxu0 %v1748_v12  ;;  %508 = vmatpush1.bf16.msra.mxu1 %v1789_v19 }
 0x138   :  { %468 = vmatprep.subr.bf16.mxu0 %v1753_v13  ;;  %509 = vmatprep.subr.bf16.mxu1 %v1795_v20 }
 0x13b   :  { %469 = vmatpush1.bf16.msra.mxu0 %v1777_v17  ;;  %510 = vmatpush1.bf16.msra.mxu1 %v1813_v23 }
 0x13c   :  { %470 = vmatprep.subr.bf16.mxu0 %v1783_v18  ;;  %511 = vmatprep.subr.bf16.mxu1 %v1824_v25 }
 0x13f   :  { %471 = vmatpush1.bf16.msra.mxu0 %v1801_v21  ;;  %512 = vmatpush1.bf16.msra.mxu1 %v1834_v27 }
 0x140   :  { %472 = vmatprep.subr.bf16.mxu0 %v1806_v22  ;;  %513 = vmatprep.subr.bf16.mxu1 %v1840_v28 }
 0x143   :  { %473 = vmatpush1.bf16.msra.mxu0 %v1818_v24  ;;  %514 = vmatpush1.bf16.msra.mxu1 %v1856_v30 }
 0x144   :  { %474 = vmatprep.subr.bf16.mxu0 %v1829_v26  ;;  %515 = vmatprep.subr.bf16.mxu1 %v1862_v31 }
 0x147   :  { %475 = vmatpush1.bf16.msra.mxu0 %v1849_v29  ;;  %516 = vmatpush1.bf16.msra.mxu1 %v1869_v32 }
 0x148   :  { %576 = vmatprep.subr.bf16.mxu0 %v1684_v1  ;;  %617 = vmatprep.subr.bf16.mxu1 %v1712_v6 }
 0x1ea   :  { %v378_v38 = vpop.f32.mrf.mxu0  ;;  %v419_v39 = vpop.f32.mrf.mxu1 }
 0x1eb   :  { %v426_v41 = vadd.f32 %v1309_v37, %v378_v38  ;;  %v428_v52 = vadd.f32 %v1311_v51, %v419_v39 }
 0x1ec   :  { %v380_v42 = vpop.f32.mrf.mxu0  ;;  %v421_v43 = vpop.f32.mrf.mxu1 }
 0x1ed   :  { %v1313_v44 = vmul.f32 -1.442695, %v426_v41  ;;  %v427_v45 = vadd.f32 %v1310_v40, %v380_v42  ;;  %v1315_v54 = vmul.f32 -1.442695, %v428_v52  ;;  %v429_v56 = vadd.f32 %v1312_v53, %v421_v43 }
 0x1ee   :  { %v382_v46 = vpop.f32.mrf.mxu0  ;;  %v423_v47 = vpop.f32.mrf.mxu1 }
 0x1ef   :  { %1475 = vpow2.f32 %v1313_v44  ;;  %v1314_v48 = vmul.f32 -1.442695, %v427_v45  ;;  %v1317_v44 = vld [vmem:[%s2307_s0 + $0x48] sm:$0xff] }
 0x1f0   :  { %v383_v49 = vpop.f32.mrf.mxu0  ;;  %v424_v50 = vpop.f32.mrf.mxu1 }
 0x1f1   :  { %1477 = vpow2.f32 %v1314_v48 }
 0x1f2   :  { %1479 = vpow2.f32 %v1315_v54 }
 0x1fc   :  { %v1476_v55 = vpop.eup %1475 }
 0x1fd   :  { %v439_v57 = vadd.f32 1.0, %v1476_v55  ;;  %v1318_v55 = vld [vmem:[%s2307_s0 + $0x50] sm:$0xff] }
 0x1fe   :  { %v1478_v58 = vpop.eup %1477 }
 0x1ff   :  { %1481 = vrcp.f32 %v439_v57  ;;  %v440_v59 = vadd.f32 1.0, %v1478_v58  ;;  %v1480_v60 = vpop.eup %1479  ;;  %v1319_v57 = vld [vmem:[%s2307_s0 + $0x58] sm:$0xff] }
 0x200   :  { %1483 = vtanh.f32 %v429_v56  ;;  %v441_v34 = vadd.f32 1.0, %v1480_v60 }
 0x201   :  { %1485 = vrcp.f32 %v440_v59 }
 0x202   :  { %1487 = vrcp.f32 %v441_v34 }
 0x20c   :  { %v1482_v61 = vpop.eup %1481 }
 0x20d   :  { %v1484_v62 = vpop.eup %1483 }
 0x20e   :  { %v1486_v33 = vpop.eup %1485  ;;  %v450_v36 = vmul.f32 %v1484_v62, %v1482_v61 }
 0x20f   :  { %v449_v35 = vmul.f32 %v1486_v33, %v1923_v63  ;;  %v1488_v38 = vpop.eup %1487  ;;  %v1316_v63 = vld [vmem:[%s2307_s0 + $0x40] sm:$0xff] }
 0x211   :  { %v1973_v37 = vadd.f32 %v450_v36, %v449_v35 }
 0x213   :  { %1489 = vtanh.f32 %v1973_v37 }
 0x220   :  { %v1490_v39 = vpop.eup %1489 }
 0x221   :  { %v453_v40 = vmul.f32 %v1490_v39, %v1488_v38 }
 0x223   :  { %v459_v41 = vpack.c.bf16 %v453_v40, %v453_v40 }
 0x225   :  { %493 = vmatmul.mubr.bf16.vlgmr.msra.gmra.mxu0 %v459_v41  ;;  %534 = vmatmul.mubr.bf16.vlgmr.msra.gmra.mxu1 %v459_v41 }
 0x226   :  { %577 = vmatpush1.bf16.msra.mxu0 %v1689_v2  ;;  %618 = vmatpush1.bf16.msra.mxu1 %v1717_v7 }
 0x227   :  { %578 = vmatprep.subr.bf16.mxu0 %v1695_v3  ;;  %619 = vmatprep.subr.bf16.mxu1 %v1736_v10 }
 0x228   :  { %608 = vmatprep.mubr.bf16.mxu0 %v1648_v0  ;;  %649 = vmatprep.mubr.bf16.mxu1 %v1648_v0 }
 0x22a   :  { %579 = vmatpush1.bf16.msra.mxu0 %v1701_v4  ;;  %620 = vmatpush1.bf16.msra.mxu1 %v1741_v11 }
 0x22b   :  { %580 = vmatprep.subr.bf16.mxu0 %v1707_v5  ;;  %621 = vmatprep.subr.bf16.mxu1 %v1758_v14 }
 0x22e   :  { %581 = vmatpush1.bf16.msra.mxu0 %v1723_v8  ;;  %622 = vmatpush1.bf16.msra.mxu1 %v1765_v15 }
 0x22f   :  { %582 = vmatprep.subr.bf16.mxu0 %v1730_v9  ;;  %623 = vmatprep.subr.bf16.mxu1 %v1771_v16 }
 0x232   :  { %583 = vmatpush1.bf16.msra.mxu0 %v1748_v12  ;;  %624 = vmatpush1.bf16.msra.mxu1 %v1789_v19 }
 0x233   :  { %584 = vmatprep.subr.bf16.mxu0 %v1753_v13  ;;  %625 = vmatprep.subr.bf16.mxu1 %v1795_v20 }
 0x236   :  { %585 = vmatpush1.bf16.msra.mxu0 %v1777_v17  ;;  %626 = vmatpush1.bf16.msra.mxu1 %v1813_v23 }
 0x237   :  { %586 = vmatprep.subr.bf16.mxu0 %v1783_v18  ;;  %627 = vmatprep.subr.bf16.mxu1 %v1824_v25 }
 0x23a   :  { %587 = vmatpush1.bf16.msra.mxu0 %v1801_v21  ;;  %628 = vmatpush1.bf16.msra.mxu1 %v1834_v27 }
 0x23b   :  { %588 = vmatprep.subr.bf16.mxu0 %v1806_v22  ;;  %629 = vmatprep.subr.bf16.mxu1 %v1840_v28 }
 0x23e   :  { %589 = vmatpush1.bf16.msra.mxu0 %v1818_v24  ;;  %630 = vmatpush1.bf16.msra.mxu1 %v1856_v30 }
 0x23f   :  { %590 = vmatprep.subr.bf16.mxu0 %v1829_v26  ;;  %631 = vmatprep.subr.bf16.mxu1 %v1862_v31 }
 0x242   :  { %591 = vmatpush1.bf16.msra.mxu0 %v1849_v29  ;;  %632 = vmatpush1.bf16.msra.mxu1 %v1869_v32 }
 0x243   :  { %692 = vmatprep.subr.bf16.mxu0 %v1684_v1  ;;  %733 = vmatprep.subr.bf16.mxu1 %v1712_v6 }
 0x2e5   :  { %v494_v42 = vpop.f32.mrf.mxu0  ;;  %v535_v43 = vpop.f32.mrf.mxu1 }
 0x2e6   :  { %v542_v45 = vadd.f32 %v1316_v63, %v494_v42  ;;  %v544_v56 = vadd.f32 %v1318_v55, %v535_v43 }
 0x2e7   :  { %v496_v46 = vpop.f32.mrf.mxu0  ;;  %v537_v47 = vpop.f32.mrf.mxu1 }
 0x2e8   :  { %v1320_v48 = vmul.f32 -1.442695, %v542_v45  ;;  %v543_v49 = vadd.f32 %v1317_v44, %v496_v46  ;;  %v1322_v58 = vmul.f32 -1.442695, %v544_v56  ;;  %v545_v60 = vadd.f32 %v1319_v57, %v537_v47 }
 0x2e9   :  { %v498_v50 = vpop.f32.mrf.mxu0  ;;  %v539_v51 = vpop.f32.mrf.mxu1 }
 0x2ea   :  { %1491 = vpow2.f32 %v1320_v48  ;;  %v1321_v52 = vmul.f32 -1.442695, %v543_v49  ;;  %v1324_v48 = vld [vmem:[%s2307_s0 + $0x68] sm:$0xff] }
 0x2eb   :  { %v499_v53 = vpop.f32.mrf.mxu0  ;;  %v540_v54 = vpop.f32.mrf.mxu1 }
 0x2ec   :  { %1493 = vpow2.f32 %v1321_v52 }
 0x2ed   :  { %1495 = vpow2.f32 %v1322_v58 }
 0x2f7   :  { %v1492_v59 = vpop.eup %1491 }
 0x2f8   :  { %v555_v61 = vadd.f32 1.0, %v1492_v59  ;;  %v1325_v59 = vld [vmem:[%s2307_s0 + $0x70] sm:$0xff] }
 0x2f9   :  { %v1494_v62 = vpop.eup %1493 }
 0x2fa   :  { %1497 = vrcp.f32 %v555_v61  ;;  %v556_v33 = vadd.f32 1.0, %v1494_v62  ;;  %v1496_v34 = vpop.eup %1495  ;;  %v1326_v61 = vld [vmem:[%s2307_s0 + $0x78] sm:$0xff] }
 0x2fb   :  { %1499 = vtanh.f32 %v545_v60  ;;  %v557_v39 = vadd.f32 1.0, %v1496_v34 }
 0x2fc   :  { %1501 = vrcp.f32 %v556_v33 }
 0x2fd   :  { %1503 = vrcp.f32 %v557_v39 }
 0x307   :  { %v1498_v35 = vpop.eup %1497 }
 0x308   :  { %v1500_v36 = vpop.eup %1499 }
 0x309   :  { %v1502_v38 = vpop.eup %1501  ;;  %v566_v41 = vmul.f32 %v1500_v36, %v1498_v35 }
 0x30a   :  { %v565_v40 = vmul.f32 %v1502_v38, %v1973_v37  ;;  %v1504_v42 = vpop.eup %1503  ;;  %v1323_v37 = vld [vmem:[%s2307_s0 + $0x60] sm:$0xff] }
 0x30c   :  { %v2023_v63 = vadd.f32 %v566_v41, %v565_v40 }
 0x30e   :  { %1505 = vtanh.f32 %v2023_v63 }
 0x31b   :  { %v1506_v43 = vpop.eup %1505 }
 0x31c   :  { %v569_v44 = vmul.f32 %v1506_v43, %v1504_v42 }
 0x31e   :  { %v575_v45 = vpack.c.bf16 %v569_v44, %v569_v44 }
 0x320   :  { %609 = vmatmul.mubr.bf16.vlgmr.msra.gmra.mxu0 %v575_v45  ;;  %650 = vmatmul.mubr.bf16.vlgmr.msra.gmra.mxu1 %v575_v45 }
 0x321   :  { %693 = vmatpush1.bf16.msra.mxu0 %v1689_v2  ;;  %734 = vmatpush1.bf16.msra.mxu1 %v1717_v7 }
 0x322   :  { %694 = vmatprep.subr.bf16.mxu0 %v1695_v3  ;;  %735 = vmatprep.subr.bf16.mxu1 %v1736_v10 }
 0x323   :  { %724 = vmatprep.mubr.bf16.mxu0 %v1648_v0  ;;  %765 = vmatprep.mubr.bf16.mxu1 %v1648_v0 }
 0x325   :  { %695 = vmatpush1.bf16.msra.mxu0 %v1701_v4  ;;  %736 = vmatpush1.bf16.msra.mxu1 %v1741_v11 }
 0x326   :  { %696 = vmatprep.subr.bf16.mxu0 %v1707_v5  ;;  %737 = vmatprep.subr.bf16.mxu1 %v1758_v14 }
 0x329   :  { %697 = vmatpush1.bf16.msra.mxu0 %v1723_v8  ;;  %738 = vmatpush1.bf16.msra.mxu1 %v1765_v15 }
 0x32a   :  { %698 = vmatprep.subr.bf16.mxu0 %v1730_v9  ;;  %739 = vmatprep.subr.bf16.mxu1 %v1771_v16 }
 0x32d   :  { %699 = vmatpush1.bf16.msra.mxu0 %v1748_v12  ;;  %740 = vmatpush1.bf16.msra.mxu1 %v1789_v19 }
 0x32e   :  { %700 = vmatprep.subr.bf16.mxu0 %v1753_v13  ;;  %741 = vmatprep.subr.bf16.mxu1 %v1795_v20 }
 0x331   :  { %701 = vmatpush1.bf16.msra.mxu0 %v1777_v17  ;;  %742 = vmatpush1.bf16.msra.mxu1 %v1813_v23 }
 0x332   :  { %702 = vmatprep.subr.bf16.mxu0 %v1783_v18  ;;  %743 = vmatprep.subr.bf16.mxu1 %v1824_v25 }
 0x335   :  { %703 = vmatpush1.bf16.msra.mxu0 %v1801_v21  ;;  %744 = vmatpush1.bf16.msra.mxu1 %v1834_v27 }
 0x336   :  { %704 = vmatprep.subr.bf16.mxu0 %v1806_v22  ;;  %745 = vmatprep.subr.bf16.mxu1 %v1840_v28 }
 0x339   :  { %705 = vmatpush1.bf16.msra.mxu0 %v1818_v24  ;;  %746 = vmatpush1.bf16.msra.mxu1 %v1856_v30 }
 0x33a   :  { %706 = vmatprep.subr.bf16.mxu0 %v1829_v26  ;;  %747 = vmatprep.subr.bf16.mxu1 %v1862_v31 }
 0x33d   :  { %707 = vmatpush1.bf16.msra.mxu0 %v1849_v29  ;;  %748 = vmatpush1.bf16.msra.mxu1 %v1869_v32 }
 0x33e   :  { %808 = vmatprep.subr.bf16.mxu0 %v1684_v1  ;;  %849 = vmatprep.subr.bf16.mxu1 %v1712_v6 }
 0x3e0   :  { %v610_v46 = vpop.f32.mrf.mxu0  ;;  %v651_v47 = vpop.f32.mrf.mxu1 }
 0x3e1   :  { %v658_v49 = vadd.f32 %v1323_v37, %v610_v46  ;;  %v660_v60 = vadd.f32 %v1325_v59, %v651_v47 }
 0x3e2   :  { %v612_v50 = vpop.f32.mrf.mxu0  ;;  %v653_v51 = vpop.f32.mrf.mxu1 }
 0x3e3   :  { %v1327_v52 = vmul.f32 -1.442695, %v658_v49  ;;  %v659_v53 = vadd.f32 %v1324_v48, %v612_v50  ;;  %v1329_v62 = vmul.f32 -1.442695, %v660_v60  ;;  %v661_v34 = vadd.f32 %v1326_v61, %v653_v51  ;;  %v1332_v61 = vld [vmem:[%s2307_s0 + $0x90] sm:$0xff] }
 0x3e4   :  { %v614_v54 = vpop.f32.mrf.mxu0  ;;  %v655_v55 = vpop.f32.mrf.mxu1 }
 0x3e5   :  { %1507 = vpow2.f32 %v1327_v52  ;;  %v1328_v56 = vmul.f32 -1.442695, %v659_v53  ;;  %v1331_v52 = vld [vmem:[%s2307_s0 + $0x88] sm:$0xff] }
 0x3e6   :  { %v615_v57 = vpop.f32.mrf.mxu0  ;;  %v656_v58 = vpop.f32.mrf.mxu1 }
 0x3e7   :  { %1509 = vpow2.f32 %v1328_v56 }
 0x3e8   :  { %1511 = vpow2.f32 %v1329_v62 }
 0x3f2   :  { %v1508_v33 = vpop.eup %1507 }
 0x3f3   :  { %v671_v35 = vadd.f32 1.0, %v1508_v33  ;;  %v1333_v33 = vld [vmem:[%s2307_s0 + $0x98] sm:$0xff] }
 0x3f4   :  { %v1510_v36 = vpop.eup %1509 }
 0x3f5   :  { %1513 = vrcp.f32 %v671_v35  ;;  %v672_v38 = vadd.f32 1.0, %v1510_v36  ;;  %v1512_v39 = vpop.eup %1511 }
 0x3f6   :  { %1515 = vtanh.f32 %v661_v34  ;;  %v673_v43 = vadd.f32 1.0, %v1512_v39 }
 0x3f7   :  { %1517 = vrcp.f32 %v672_v38 }
 0x3f8   :  { %1519 = vrcp.f32 %v673_v43 }
 0x402   :  { %v1514_v40 = vpop.eup %1513 }
 0x403   :  { %v1516_v41 = vpop.eup %1515 }
 0x404   :  { %v1518_v42 = vpop.eup %1517  ;;  %v682_v45 = vmul.f32 %v1516_v41, %v1514_v40 }
 0x405   :  { %v681_v44 = vmul.f32 %v1518_v42, %v2023_v63  ;;  %v1520_v46 = vpop.eup %1519  ;;  %v1330_v63 = vld [vmem:[%s2307_s0 + $0x80] sm:$0xff] }
 0x407   :  { %v2073_v37 = vadd.f32 %v682_v45, %v681_v44 }
 0x409   :  { %1521 = vtanh.f32 %v2073_v37 }
 0x416   :  { %v1522_v47 = vpop.eup %1521 }
 0x417   :  { %v685_v48 = vmul.f32 %v1522_v47, %v1520_v46 }
 0x419   :  { %v691_v49 = vpack.c.bf16 %v685_v48, %v685_v48 }
 0x41b   :  { %725 = vmatmul.mubr.bf16.vlgmr.msra.gmra.mxu0 %v691_v49  ;;  %766 = vmatmul.mubr.bf16.vlgmr.msra.gmra.mxu1 %v691_v49 }
 0x41c   :  { %809 = vmatpush1.bf16.msra.mxu0 %v1689_v2  ;;  %850 = vmatpush1.bf16.msra.mxu1 %v1717_v7 }
 0x41d   :  { %810 = vmatprep.subr.bf16.mxu0 %v1695_v3  ;;  %851 = vmatprep.subr.bf16.mxu1 %v1736_v10 }
 0x41e   :  { %840 = vmatprep.mubr.bf16.mxu0 %v1648_v0  ;;  %881 = vmatprep.mubr.bf16.mxu1 %v1648_v0 }
 0x420   :  { %811 = vmatpush1.bf16.msra.mxu0 %v1701_v4  ;;  %852 = vmatpush1.bf16.msra.mxu1 %v1741_v11 }
 0x421   :  { %812 = vmatprep.subr.bf16.mxu0 %v1707_v5  ;;  %853 = vmatprep.subr.bf16.mxu1 %v1758_v14 }
 0x424   :  { %813 = vmatpush1.bf16.msra.mxu0 %v1723_v8  ;;  %854 = vmatpush1.bf16.msra.mxu1 %v1765_v15 }
 0x425   :  { %814 = vmatprep.subr.bf16.mxu0 %v1730_v9  ;;  %855 = vmatprep.subr.bf16.mxu1 %v1771_v16 }
 0x428   :  { %815 = vmatpush1.bf16.msra.mxu0 %v1748_v12  ;;  %856 = vmatpush1.bf16.msra.mxu1 %v1789_v19 }
 0x429   :  { %816 = vmatprep.subr.bf16.mxu0 %v1753_v13  ;;  %857 = vmatprep.subr.bf16.mxu1 %v1795_v20 }
 0x42c   :  { %817 = vmatpush1.bf16.msra.mxu0 %v1777_v17  ;;  %858 = vmatpush1.bf16.msra.mxu1 %v1813_v23 }
 0x42d   :  { %818 = vmatprep.subr.bf16.mxu0 %v1783_v18  ;;  %859 = vmatprep.subr.bf16.mxu1 %v1824_v25 }
 0x430   :  { %819 = vmatpush1.bf16.msra.mxu0 %v1801_v21  ;;  %860 = vmatpush1.bf16.msra.mxu1 %v1834_v27 }
 0x431   :  { %820 = vmatprep.subr.bf16.mxu0 %v1806_v22  ;;  %861 = vmatprep.subr.bf16.mxu1 %v1840_v28 }
 0x434   :  { %821 = vmatpush1.bf16.msra.mxu0 %v1818_v24  ;;  %862 = vmatpush1.bf16.msra.mxu1 %v1856_v30 }
 0x435   :  { %822 = vmatprep.subr.bf16.mxu0 %v1829_v26  ;;  %863 = vmatprep.subr.bf16.mxu1 %v1862_v31 }
 0x438   :  { %823 = vmatpush1.bf16.msra.mxu0 %v1849_v29  ;;  %864 = vmatpush1.bf16.msra.mxu1 %v1869_v32 }
 0x439   :  { %924 = vmatprep.subr.bf16.mxu0 %v1684_v1  ;;  %965 = vmatprep.subr.bf16.mxu1 %v1712_v6 }
 0x4db   :  { %v726_v50 = vpop.f32.mrf.mxu0  ;;  %v767_v51 = vpop.f32.mrf.mxu1 }
 0x4dc   :  { %v774_v53 = vadd.f32 %v1330_v63, %v726_v50  ;;  %v776_v62 = vadd.f32 %v1332_v61, %v767_v51  ;;  %v1598_v61 = vld [vmem:[%s2308_s1 + $0xc8] ss:$16 sps:$4 sm:$0xff]  }
 0x4dd   :  { %v728_v54 = vpop.f32.mrf.mxu0  ;;  %v769_v55 = vpop.f32.mrf.mxu1 }
 0x4de   :  { %v1334_v56 = vmul.f32 -1.442695, %v774_v53  ;;  %v775_v57 = vadd.f32 %v1331_v52, %v728_v54  ;;  %v1336_v34 = vmul.f32 -1.442695, %v776_v62  ;;  %v777_v36 = vadd.f32 %v1333_v33, %v769_v55  ;;  %v1599_v62 = vld [vmem:[%s2308_s1 + $0xa4] ss:$16 sps:$4 sm:$0xff]  }
 0x4df   :  { %v730_v58 = vpop.f32.mrf.mxu0  ;;  %v771_v59 = vpop.f32.mrf.mxu1  ;;  %v1600_v33 = vld [vmem:[%s2308_s1 + $0xac] ss:$16 sps:$4 sm:$0xff]  }
 0x4e0   :  { %1523 = vpow2.f32 %v1334_v56  ;;  %v1335_v1 = vmul.f32 -1.442695, %v775_v57  ;;  %v1593_v58 = vld [vmem:[%s2308_s1 + $0xe0] ss:$16 sps:$4 sm:$0xff]   ;;  %v1594_v59 = vld [vmem:[%s2308_s1 + $0xe8] ss:$16 sps:$4 sm:$0xff]  }
 0x4e1   :  { %v731_v6 = vpop.f32.mrf.mxu0  ;;  %v772_v60 = vpop.f32.mrf.mxu1 }
 0x4e2   :  { %1525 = vpow2.f32 %v1335_v1  ;;  %v1595_v1 = vld [vmem:[%s2308_s1 + $0xc4] ss:$16 sps:$4 sm:$0xff]   ;;  %v1596_v6 = vld [vmem:[%s2308_s1 + $0xcc] ss:$16 sps:$4 sm:$0xff]   ;;  %v1597_v60 = vld [vmem:[%s2308_s1 + $0xc0] ss:$16 sps:$4 sm:$0xff]  }
 0x4e3   :  { %1527 = vpow2.f32 %v1336_v34  ;;  %v1602_v34 = vld [vmem:[%s2308_s1 + $0xa8] ss:$16 sps:$4 sm:$0xff]  }
 0x4ed   :  { %v1524_v35 = vpop.eup %1523 }
 0x4ee   :  { %v787_v38 = vadd.f32 1.0, %v1524_v35  ;;  %v1603_v35 = vld [vmem:[%s2308_s1 + $0x84] ss:$16 sps:$4 sm:$0xff]  }
 0x4ef   :  { %v1526_v39 = vpop.eup %1525 }
 0x4f0   :  { %1529 = vrcp.f32 %v787_v38  ;;  %v788_v40 = vadd.f32 1.0, %v1526_v39  ;;  %v1528_v41 = vpop.eup %1527  ;;  %v1605_v38 = vld [vmem:[%s2308_s1 + $0x80] ss:$16 sps:$4 sm:$0xff]   ;;  %v1606_v39 = vld [vmem:[%s2308_s1 + $0x88] ss:$16 sps:$4 sm:$0xff]  }
 0x4f1   :  { %1531 = vtanh.f32 %v777_v36  ;;  %v789_v45 = vadd.f32 1.0, %v1528_v41  ;;  %v1604_v36 = vld [vmem:[%s2308_s1 + $0x8c] ss:$16 sps:$4 sm:$0xff]  }
 0x4f2   :  { %1533 = vrcp.f32 %v788_v40  ;;  %v1607_v40 = vld [vmem:[%s2308_s1 + $0x64] ss:$16 sps:$4 sm:$0xff]   ;;  %v1608_v41 = vld [vmem:[%s2308_s1 + $0x6c] ss:$16 sps:$4 sm:$0xff]  }
 0x4f3   :  { %1535 = vrcp.f32 %v789_v45  ;;  %v1612_v45 = vld [vmem:[%s2308_s1 + $0x4c] ss:$16 sps:$4 sm:$0xff]  }
 0x4fd   :  { %v1530_v42 = vpop.eup %1529 }
 0x4fe   :  { %v1532_v43 = vpop.eup %1531 }
 0x4ff   :  { %v1534_v44 = vpop.eup %1533  ;;  %v798_v47 = vmul.f32 %v1532_v43, %v1530_v42  ;;  %v1609_v42 = vld [vmem:[%s2308_s1 + $0x60] ss:$16 sps:$4 sm:$0xff]   ;;  %v1610_v43 = vld [vmem:[%s2308_s1 + $0x68] ss:$16 sps:$4 sm:$0xff]  }
 0x500   :  { %v797_v46 = vmul.f32 %v1534_v44, %v2073_v37  ;;  %v1536_v49 = vpop.eup %1535  ;;  %v1611_v44 = vld [vmem:[%s2308_s1 + $0x44] ss:$16 sps:$4 sm:$0xff]  }
 0x502   :  { %v2123_v48 = vadd.f32 %v798_v47, %v797_v46  ;;  %v1613_v46 = vld [vmem:[%s2308_s1 + $0x40] ss:$16 sps:$4 sm:$0xff]   ;;  %v1614_v47 = vld [vmem:[%s2308_s1 + $0x48] ss:$16 sps:$4 sm:$0xff]  }
 0x504   :  { %1537 = vtanh.f32 %v2123_v48 }
 0x511   :  { %v1538_v63 = vpop.eup %1537 }
 0x512   :  { %v801_v50 = vmul.f32 %v1538_v63, %v1536_v49  ;;  %v1616_v49 = vld [vmem:[%s2308_s1 + $0x2c] ss:$16 sps:$4 sm:$0xff]   ;;  %v1617_v63 = vld [vmem:[%s2308_s1 + $0x20] ss:$16 sps:$4 sm:$0xff]  }
 0x514   :  { %v807_v51 = vpack.c.bf16 %v801_v50, %v801_v50  ;;  %v1618_v50 = vld [vmem:[%s2308_s1 + $0x28] ss:$16 sps:$4 sm:$0xff]  }
 0x516   :  { %841 = vmatmul.mubr.bf16.vlgmr.msra.gmra.mxu0 %v807_v51  ;;  %882 = vmatmul.mubr.bf16.vlgmr.msra.gmra.mxu1 %v807_v51  ;;  %v1619_v51 = vld [vmem:[%s2308_s1 + $0x4] ss:$16 sps:$4 sm:$0xff]  }
 0x517   :  { %925 = vmatpush1.bf16.msra.mxu0 %v1689_v2  ;;  %966 = vmatpush1.bf16.msra.mxu1 %v1717_v7  ;;  %v1591_v2 = vld [vmem:[%s2308_s1 + $0xe4] ss:$16 sps:$4 sm:$0xff]  }
 0x518   :  { %926 = vmatprep.subr.bf16.mxu0 %v1695_v3  ;;  %967 = vmatprep.subr.bf16.mxu1 %v1736_v10  ;;  %v1592_v3 = vld [vmem:[%s2308_s1 + $0xec] ss:$16 sps:$4 sm:$0xff]  }
 0x519   :  { %956 = vmatprep.mubr.bf16.mxu0 %v1648_v0  ;;  %997 = vmatprep.mubr.bf16.mxu1 %v1648_v0 }
 0x51b   :  { %927 = vmatpush1.bf16.msra.mxu0 %v1701_v4  ;;  %968 = vmatpush1.bf16.msra.mxu1 %v1741_v11  ;;  %v1337_v4 = vld [vmem:[%s2307_s0 + $0xa0] sm:$0xff] }
 0x51c   :  { %928 = vmatprep.subr.bf16.mxu0 %v1707_v5  ;;  %969 = vmatprep.subr.bf16.mxu1 %v1758_v14 }
 0x51f   :  { %929 = vmatpush1.bf16.msra.mxu0 %v1723_v8  ;;  %970 = vmatpush1.bf16.msra.mxu1 %v1765_v15  ;;  %v1338_v8 = vld [vmem:[%s2307_s0 + $0xa8] sm:$0xff] }
 0x520   :  { %930 = vmatprep.subr.bf16.mxu0 %v1730_v9  ;;  %971 = vmatprep.subr.bf16.mxu1 %v1771_v16 }
 0x523   :  { %931 = vmatpush1.bf16.msra.mxu0 %v1748_v12  ;;  %972 = vmatpush1.bf16.msra.mxu1 %v1789_v19  ;;  %v1339_v19 = vld [vmem:[%s2307_s0 + $0xb0] sm:$0xff] }
 0x524   :  { %932 = vmatprep.subr.bf16.mxu0 %v1753_v13  ;;  %973 = vmatprep.subr.bf16.mxu1 %v1795_v20 }
 0x527   :  { %933 = vmatpush1.bf16.msra.mxu0 %v1777_v17  ;;  %974 = vmatpush1.bf16.msra.mxu1 %v1813_v23 }
 0x528   :  { %934 = vmatprep.subr.bf16.mxu0 %v1783_v18  ;;  %975 = vmatprep.subr.bf16.mxu1 %v1824_v25 }
 0x52b   :  { %935 = vmatpush1.bf16.msra.mxu0 %v1801_v21  ;;  %976 = vmatpush1.bf16.msra.mxu1 %v1834_v27  ;;  %v1340_v21 = vld [vmem:[%s2307_s0 + $0xb8] sm:$0xff] }
 0x52c   :  { %936 = vmatprep.subr.bf16.mxu0 %v1806_v22  ;;  %977 = vmatprep.subr.bf16.mxu1 %v1840_v28 }
 0x52f   :  { %937 = vmatpush1.bf16.msra.mxu0 %v1818_v24  ;;  %978 = vmatpush1.bf16.msra.mxu1 %v1856_v30 }
 0x530   :  { %938 = vmatprep.subr.bf16.mxu0 %v1829_v26  ;;  %979 = vmatprep.subr.bf16.mxu1 %v1862_v31 }
 0x533   :  { %939 = vmatpush1.bf16.msra.mxu0 %v1849_v29  ;;  %980 = vmatpush1.bf16.msra.mxu1 %v1869_v32 }
 0x534   :  { %1040 = vmatprep.subr.bf16.mxu0 %v1591_v2  ;;  %1081 = vmatprep.subr.bf16.mxu1 %v1592_v3  ;;  %v1620_v2 = vld [vmem:[%s2308_s1 + $0xc] ss:$16 sps:$4 sm:$0xff]   ;;  %v1621_v3 = vld [vmem:[%s2308_s1] ss:$16 sps:$4 sm:$0xff]  }
 0x5d6   :  { %v842_v5 = vpop.f32.mrf.mxu0  ;;  %v883_v7 = vpop.f32.mrf.mxu1 }
 0x5d7   :  { %v890_v9 = vadd.f32 %v1337_v4, %v842_v5  ;;  %v892_v20 = vadd.f32 %v1339_v19, %v883_v7  ;;  %v1622_v4 = vld [vmem:[%s2308_s1 + $0x8] ss:$16 sps:$4 sm:$0xff]   ;;  %v1344_v5 = vld [vmem:[%s2307_s0 + $0xc0] sm:$0xff] }
 0x5d8   :  { %v844_v10 = vpop.f32.mrf.mxu0  ;;  %v885_v11 = vpop.f32.mrf.mxu1 }
 0x5d9   :  { %v1341_v12 = vmul.f32 -1.442695, %v890_v9  ;;  %v891_v13 = vadd.f32 %v1338_v8, %v844_v10  ;;  %v1343_v22 = vmul.f32 -1.442695, %v892_v20  ;;  %v893_v24 = vadd.f32 %v1340_v21, %v885_v11  ;;  %v1345_v9 = vld [vmem:[%s2307_s0 + $0xc8] sm:$0xff]  ;;  %v1346_v20 = vld [vmem:[%s2307_s0 + $0xd0] sm:$0xff] }
 0x5da   :  { %v846_v14 = vpop.f32.mrf.mxu0  ;;  %v887_v15 = vpop.f32.mrf.mxu1 }
 0x5db   :  { %1539 = vpow2.f32 %v1341_v12  ;;  %v1342_v16 = vmul.f32 -1.442695, %v891_v13 }
 0x5dc   :  { %v847_v17 = vpop.f32.mrf.mxu0  ;;  %v888_v18 = vpop.f32.mrf.mxu1 }
 0x5dd   :  { %1541 = vpow2.f32 %v1342_v16 }
 0x5de   :  { %1543 = vpow2.f32 %v1343_v22  ;;  %v1347_v22 = vld [vmem:[%s2307_s0 + $0xd8] sm:$0xff] }
 0x5e8   :  { %v1540_v23 = vpop.eup %1539 }
 0x5e9   :  { %v903_v25 = vadd.f32 1.0, %v1540_v23 }
 0x5ea   :  { %v1542_v26 = vpop.eup %1541 }
 0x5eb   :  { %1545 = vrcp.f32 %v903_v25  ;;  %v904_v27 = vadd.f32 1.0, %v1542_v26  ;;  %v1544_v28 = vpop.eup %1543 }
 0x5ec   :  { %1547 = vtanh.f32 %v893_v24  ;;  %v905_v32 = vadd.f32 1.0, %v1544_v28 }
 0x5ed   :  { %1549 = vrcp.f32 %v904_v27 }
 0x5ee   :  { %1551 = vrcp.f32 %v905_v32 }
 0x5f8   :  { %v1546_v29 = vpop.eup %1545 }
 0x5f9   :  { %v1548_v30 = vpop.eup %1547 }
 0x5fa   :  { %v1550_v31 = vpop.eup %1549  ;;  %v914_v52 = vmul.f32 %v1548_v30, %v1546_v29 }
 0x5fb   :  { %v913_v37 = vmul.f32 %v1550_v31, %v2123_v48  ;;  %v1552_v54 = vpop.eup %1551  ;;  %v1615_v48 = vld [vmem:[%s2308_s1 + $0x24] ss:$16 sps:$4 sm:$0xff]  }
 0x5fd   :  { %v2177_v53 = vadd.f32 %v914_v52, %v913_v37 }
 0x5ff   :  { %1553 = vtanh.f32 %v2177_v53 }
 0x60c   :  { %v1554_v55 = vpop.eup %1553 }
 0x60d   :  { %v917_v56 = vmul.f32 %v1554_v55, %v1552_v54 }
 0x60f   :  { %v923_v57 = vpack.c.bf16 %v917_v56, %v917_v56 }
 0x611   :  { %957 = vmatmul.mubr.bf16.vlgmr.msra.gmra.mxu0 %v923_v57  ;;  %998 = vmatmul.mubr.bf16.vlgmr.msra.gmra.mxu1 %v923_v57 }
 0x612   :  { %1041 = vmatpush1.bf16.msra.mxu0 %v1593_v58  ;;  %1082 = vmatpush1.bf16.msra.mxu1 %v1594_v59 }
 0x613   :  { %1042 = vmatprep.subr.bf16.mxu0 %v1595_v1  ;;  %1083 = vmatprep.subr.bf16.mxu1 %v1596_v6  ;;  %v1451_v1 = vld [vmem:[#allocation2 + $0x38] sm:$0xff]   ;;  %v1649_v6 = vmov 0.0  }
 0x614   :  { %1072 = vmatprep.mubr.bf16.mxu0 %v1648_v0  ;;  %1113 = vmatprep.mubr.bf16.mxu1 %v1648_v0  ;;  %v1601_v0 = vld [vmem:[%s2308_s1 + $0xa0] ss:$16 sps:$4 sm:$0xff]  }
 0x616   :  { %1043 = vmatpush1.bf16.msra.mxu0 %v1597_v60  ;;  %1084 = vmatpush1.bf16.msra.mxu1 %v1598_v61  ;;  %v1452_v60 = vld [vmem:[#allocation2 + $0x30] sm:$0xff]   ;;  %v1454_v61 = vld [vmem:[#allocation2 + $0x20] sm:$0xff]  }
 0x617   :  { %1044 = vmatprep.subr.bf16.mxu0 %v1599_v62  ;;  %1085 = vmatprep.subr.bf16.mxu1 %v1600_v33  ;;  %v1455_v62 = vld [vmem:[#allocation2 + $0x18] sm:$0xff]   ;;  %v1456_v33 = vld [vmem:[#allocation2 + $0x10] sm:$0xff]  }
 0x61a   :  { %1045 = vmatpush1.bf16.msra.mxu0 %v1601_v0  ;;  %1086 = vmatpush1.bf16.msra.mxu1 %v1602_v34  ;;  %v1457_v0 = vld [vmem:[#allocation2 + $0x8] sm:$0xff]   ;;  %v1458_v34 = vld [vmem:[#allocation2] sm:$0xff]  }
 0x61b   :  { %1046 = vmatprep.subr.bf16.mxu0 %v1603_v35  ;;  %1087 = vmatprep.subr.bf16.mxu1 %v1604_v36  ;;  %v1351_v35 = vld [vmem:[%s2307_s0 + $0xe0] sm:$0xff] }
 0x61e   :  { %1047 = vmatpush1.bf16.msra.mxu0 %v1605_v38  ;;  %1088 = vmatpush1.bf16.msra.mxu1 %v1606_v39  ;;  %v1352_v39 = vld [vmem:[%s2307_s0 + $0xe8] sm:$0xff] }
 0x61f   :  { %1048 = vmatprep.subr.bf16.mxu0 %v1607_v40  ;;  %1089 = vmatprep.subr.bf16.mxu1 %v1608_v41 }
 0x622   :  { %1049 = vmatpush1.bf16.msra.mxu0 %v1609_v42  ;;  %1090 = vmatpush1.bf16.msra.mxu1 %v1610_v43 }
 0x623   :  { %1050 = vmatprep.subr.bf16.mxu0 %v1611_v44  ;;  %1091 = vmatprep.subr.bf16.mxu1 %v1612_v45 }
 0x626   :  { %1051 = vmatpush1.bf16.msra.mxu0 %v1613_v46  ;;  %1092 = vmatpush1.bf16.msra.mxu1 %v1614_v47 }
 0x627   :  { %1052 = vmatprep.subr.bf16.mxu0 %v1615_v48  ;;  %1093 = vmatprep.subr.bf16.mxu1 %v1616_v49 }
 0x62a   :  { %1053 = vmatpush1.bf16.msra.mxu0 %v1617_v63  ;;  %1094 = vmatpush1.bf16.msra.mxu1 %v1618_v50  ;;  %v1353_v63 = vld [vmem:[%s2307_s0 + $0xf0] sm:$0xff] }
 0x62b   :  { %1054 = vmatprep.subr.bf16.mxu0 %v1619_v51  ;;  %1095 = vmatprep.subr.bf16.mxu1 %v1620_v2  ;;  %v1354_v51 = vld [vmem:[%s2307_s0 + $0xf8] sm:$0xff] }
 0x62e   :  { %1055 = vmatpush1.bf16.msra.mxu0 %v1621_v3  ;;  %1096 = vmatpush1.bf16.msra.mxu1 %v1622_v4 }
 0x62f   :  { %1377 = vmatprep.subr.bf16.mxu0 %v1649_v6 }
 0x6d1   :  { %v958_v7 = vpop.f32.mrf.mxu0  ;;  %v999_v8 = vpop.f32.mrf.mxu1 }
 0x6d2   :  { %v1006_v10 = vadd.f32 %v1344_v5, %v958_v7  ;;  %v1008_v21 = vadd.f32 %v1346_v20, %v999_v8 }
 0x6d3   :  { %v960_v11 = vpop.f32.mrf.mxu0  ;;  %v1001_v12 = vpop.f32.mrf.mxu1 }
 0x6d4   :  { %v1348_v13 = vmul.f32 -1.442695, %v1006_v10  ;;  %v1007_v14 = vadd.f32 %v1345_v9, %v960_v11  ;;  %v1350_v23 = vmul.f32 -1.442695, %v1008_v21  ;;  %v1009_v25 = vadd.f32 %v1347_v22, %v1001_v12  ;;  %v1358_v21 = vld [vmem:[%s2310_s3] ss:$0 sm:$0xff] }
 0x6d5   :  { %v962_v15 = vpop.f32.mrf.mxu0  ;;  %v1003_v16 = vpop.f32.mrf.mxu1 }
 0x6d6   :  { %1555 = vpow2.f32 %v1348_v13  ;;  %v1349_v17 = vmul.f32 -1.442695, %v1007_v14 }
 0x6d7   :  { %v963_v18 = vpop.f32.mrf.mxu0  ;;  %v1004_v19 = vpop.f32.mrf.mxu1 }
 0x6d8   :  { %1557 = vpow2.f32 %v1349_v17 }
 0x6d9   :  { %1559 = vpow2.f32 %v1350_v23 }
 0x6e3   :  { %v1556_v24 = vpop.eup %1555 }
 0x6e4   :  { %v1019_v26 = vadd.f32 1.0, %v1556_v24 }
 0x6e5   :  { %v1558_v27 = vpop.eup %1557 }
 0x6e6   :  { %1561 = vrcp.f32 %v1019_v26  ;;  %v1020_v28 = vadd.f32 1.0, %v1558_v27  ;;  %v1560_v29 = vpop.eup %1559 }
 0x6e7   :  { %1563 = vtanh.f32 %v1009_v25  ;;  %v1021_v37 = vadd.f32 1.0, %v1560_v29 }
 0x6e8   :  { %1565 = vrcp.f32 %v1020_v28 }
 0x6e9   :  { %1567 = vrcp.f32 %v1021_v37 }
 0x6f3   :  { %v1562_v30 = vpop.eup %1561 }
 0x6f4   :  { %v1564_v31 = vpop.eup %1563 }
 0x6f5   :  { %v1566_v32 = vpop.eup %1565  ;;  %v1030_v54 = vmul.f32 %v1564_v31, %v1562_v30 }
 0x6f6   :  { %v1029_v52 = vmul.f32 %v1566_v32, %v2177_v53  ;;  %v1568_v56 = vpop.eup %1567  ;;  %v1453_v53 = vld [vmem:[#allocation2 + $0x28] sm:$0xff]  }
 0x6f8   :  { %v2285_v55 = vadd.f32 %v1030_v54, %v1029_v52 }
 0x6fa   :  { %1569 = vtanh.f32 %v2285_v55 }
 0x707   :  { %v1570_v57 = vpop.eup %1569 }
 0x708   :  { %v1033_v58 = vmul.f32 %v1570_v57, %v1568_v56 }
 0x70a   :  { %v1039_v59 = vpack.c.bf16 %v1033_v58, %v1033_v58 }
 0x70c   :  { %1073 = vmatmul.mubr.bf16.vlgmr.msra.gmra.mxu0 %v1039_v59  ;;  %1114 = vmatmul.mubr.bf16.vlgmr.msra.gmra.mxu1 %v1039_v59 }
 0x70d   :  { %1378 = vmatpush3.bf16.msra.mxu0 %v1451_v1  ;;  %1393 = vmatprep.mubr.msk.bf16.mxu0 %vm1650_vm0, %v1649_v6 }
 0x70e   :  { %1379 = vmatprep.subr.bf16.mxu0 %v1649_v6 }
 0x711   :  { %1380 = vmatpush3.bf16.msra.mxu0 %v1452_v60 }
 0x712   :  { %1381 = vmatprep.subr.bf16.mxu0 %v1649_v6 }
 0x715   :  { %1382 = vmatpush3.bf16.msra.mxu0 %v1453_v53 }
 0x716   :  { %1383 = vmatprep.subr.bf16.mxu0 %v1649_v6 }
 0x719   :  { %1384 = vmatpush3.bf16.msra.mxu0 %v1454_v61 }
 0x71a   :  { %1385 = vmatprep.subr.bf16.mxu0 %v1649_v6 }
 0x71d   :  { %1386 = vmatpush3.bf16.msra.mxu0 %v1455_v62 }
 0x71e   :  { %1387 = vmatprep.subr.bf16.mxu0 %v1649_v6 }
 0x721   :  { %1388 = vmatpush3.bf16.msra.mxu0 %v1456_v33 }
 0x722   :  { %1389 = vmatprep.subr.bf16.mxu0 %v1649_v6 }
 0x725   :  { %1390 = vmatpush3.bf16.msra.mxu0 %v1457_v0 }
 0x726   :  { %1391 = vmatprep.subr.bf16.mxu0 %v1649_v6 }
 0x729   :  { %1392 = vmatpush3.bf16.msra.mxu0 %v1458_v34 }
 0x7cc   :  { %v1074_v36 = vpop.f32.mrf.mxu0  ;;  %v1115_v38 = vpop.f32.mrf.mxu1 }
 0x7cd   :  { %v1122_v40 = vadd.f32 %v1351_v35, %v1074_v36  ;;  %v1124_v50 = vadd.f32 %v1353_v63, %v1115_v38 }
 0x7ce   :  { %v1076_v41 = vpop.f32.mrf.mxu0  ;;  %v1117_v42 = vpop.f32.mrf.mxu1 }
 0x7cf   :  { %v1355_v43 = vmul.f32 -1.442695, %v1122_v40  ;;  %v1123_v44 = vadd.f32 %v1352_v39, %v1076_v41  ;;  %v1357_v2 = vmul.f32 -1.442695, %v1124_v50  ;;  %v1125_v4 = vadd.f32 %v1354_v51, %v1117_v42 }
 0x7d0   :  { %v1078_v45 = vpop.f32.mrf.mxu0  ;;  %v1119_v46 = vpop.f32.mrf.mxu1 }
 0x7d1   :  { %1571 = vpow2.f32 %v1355_v43  ;;  %v1356_v47 = vmul.f32 -1.442695, %v1123_v44 }
 0x7d2   :  { %v1079_v48 = vpop.f32.mrf.mxu0  ;;  %v1120_v49 = vpop.f32.mrf.mxu1 }
 0x7d3   :  { %1573 = vpow2.f32 %v1356_v47 }
 0x7d4   :  { %1575 = vpow2.f32 %v1357_v2 }
 0x7de   :  { %v1572_v3 = vpop.eup %1571 }
 0x7df   :  { %v1135_v5 = vadd.f32 1.0, %v1572_v3 }
 0x7e0   :  { %v1574_v7 = vpop.eup %1573 }
 0x7e1   :  { %1577 = vrcp.f32 %v1135_v5  ;;  %v1136_v8 = vadd.f32 1.0, %v1574_v7  ;;  %v1576_v9 = vpop.eup %1575 }
 0x7e2   :  { %1579 = vtanh.f32 %v1125_v4  ;;  %v1137_v13 = vadd.f32 1.0, %v1576_v9 }
 0x7e3   :  { %1581 = vrcp.f32 %v1136_v8 }
 0x7e4   :  { %1583 = vrcp.f32 %v1137_v13 }
 0x7ee   :  { %v1578_v10 = vpop.eup %1577 }
 0x7ef   :  { %v1580_v11 = vpop.eup %1579 }
 0x7f0   :  { %v1582_v12 = vpop.eup %1581  ;;  %v1146_v15 = vmul.f32 %v1580_v11, %v1578_v10 }
 0x7f1   :  { %v1145_v14 = vmul.f32 %v1582_v12, %v2285_v55  ;;  %v1584_v17 = vpop.eup %1583 }
 0x7f3   :  { %v1147_v16 = vadd.f32 %v1146_v15, %v1145_v14 }
 0x7f5   :  { %1585 = vtanh.f32 %v1147_v16 }
 0x802   :  { %v1586_v18 = vpop.eup %1585 }
 0x803   :  { %v1149_v19 = vmul.f32 %v1586_v18, %v1584_v17 }
 0x805   :  { %v1150_v20 = vpack.c.bf16 %v1149_v19, %v1149_v19 }
 0x807   :  { %1394 = vmatmul.mubr.bf16.vlgmr.msra.gmra.mxu0 %v1150_v20 }
 0x8c7   :  { %v1256_v22 = vpop.f32.mrf.mxu0 }
 0x8c8   :  { %v1257_v23 = vadd.f32 %v1358_v21, %v1256_v22 }
 0x8c9   :  { %v1395_v24 = vpop.f32.mrf.mxu0 }
 0x8ca   :  { %v1367_v25 = vmul.f32 -1.442695, %v1257_v23 }
 0x8cb   :  { %v1259_v26 = vpop.f32.mrf.mxu0 }
 0x8cc   :  { %1587 = vpow2.f32 %v1367_v25 }
 0x8cd   :  { %v1396_v27 = vpop.f32.mrf.mxu0 }
 0x8d9   :  { %v1588_v28 = vpop.eup %1587 }
 0x8da   :  { %v1265_v29 = vadd.f32 1.0, %v1588_v28 }
 0x8dc   :  { %1589 = vrcp.f32 %v1265_v29 }
 0x8e9   :  { %v1590_v30 = vpop.eup %1589 }
 0x8ea   :  { %1268 = vst [vmem:[%s2311_s4] sm:$0xff] %v1590_v30 }
 0x8eb   :  { %1273 = vsyncpa [#allocation3], 1 }

</bundles_post_ra>
